<compile_context>
chip_gen: v6e
topology: v6e:2x2x1
jax: 0.10.0
libtpu: 0.0.40
codegen_flags: <defaults>
</compile_context>

<pallas_src>
import functools

import jax
import jax.numpy as jnp
from jax.experimental import pallas as pl
from jax.experimental.pallas import tpu as pltpu


# ----------------------------------------------------------------------------
# Fused linear (+bias) (+relu) (+row-normalize) kernel, row-tiled.
# ----------------------------------------------------------------------------
def _linear_kernel(*refs, act, has_bias, normalize):
    if has_bias:
        a_ref, w_ref, b_ref, o_ref = refs
    else:
        a_ref, w_ref, o_ref = refs
    out = jnp.dot(a_ref[...], w_ref[...], preferred_element_type=jnp.float32)
    if has_bias:
        out = out + b_ref[...]
    if act == "relu":
        out = jnp.maximum(out, 0.0)
    if normalize:
        # torch: (x - mean) / std (unbiased), NaN (std==0) -> 0
        d = out.shape[1]
        mean = jnp.mean(out, axis=1, keepdims=True)
        var = jnp.sum((out - mean) ** 2, axis=1, keepdims=True) / max(d - 1, 1)
        inv_std = jax.lax.rsqrt(var)                       # EUP slot, ~free
        y = (out - mean) * inv_std
        out = jnp.where(var > 0.0, y, jnp.zeros_like(y))
    o_ref[...] = out.astype(o_ref.dtype)


def pallas_linear(a, w, bias=None, act=None, normalize=False, block_m=512):
    """act(a[M,K] @ w[K,N] (+ bias)) optionally followed by row-normalize."""
    M, K = a.shape
    K2, N = w.shape
    assert K == K2
    a = a.astype(jnp.float32)
    w = w.astype(jnp.float32)
    bm = M if M <= block_m else block_m
    grid = (pl.cdiv(M, bm),)
    in_specs = [
        pl.BlockSpec((bm, K), lambda i: (i, 0)),
        pl.BlockSpec((K, N), lambda i: (0, 0)),
    ]
    args = [a, w]
    has_bias = bias is not None
    if has_bias:
        in_specs.append(pl.BlockSpec((1, N), lambda i: (0, 0)))
        args.append(bias.reshape(1, N).astype(jnp.float32))
    return pl.pallas_call(
        functools.partial(_linear_kernel, act=act, has_bias=has_bias,
                          normalize=normalize),
        out_shape=jax.ShapeDtypeStruct((M, N), jnp.float32),
        grid=grid,
        in_specs=in_specs,
        out_specs=pl.BlockSpec((bm, N), lambda i: (i, 0)),
        compiler_params=pltpu.CompilerParams(
            dimension_semantics=("parallel",)),
    )(*args)


# ----------------------------------------------------------------------------
# One full polynomial level, all terms batched on a grid axis:
#   for t in range(T):  out[t]  = adj[t] @ base(t)        (bf16 MXU, f32 acc)
#                       res_new += coefs[t] * out[t]      (fused, f32, in place)
# grid = (row_tiles, terms, k_tiles); res is resident across (terms, k_tiles).
# ----------------------------------------------------------------------------
def _spmm_level_kernel(coef_ref, adj_ref, x_ref, res_ref, *refs,
                       bk, emit_out, base_resident):
    if emit_out:
        out_ref, res_out_ref, acc_ref = refs
    else:
        res_out_ref, acc_ref = refs

    t = pl.program_id(1)
    k = pl.program_id(2)
    nk = pl.num_programs(2)

    # Seed the running result with res_in once per row tile.
    @pl.when(jnp.logical_and(t == 0, k == 0))
    def _():
        res_out_ref[...] = res_ref[...]

    # Fresh f32 accumulator per (row tile, term).
    @pl.when(k == 0)
    def _():
        acc_ref[...] = jnp.zeros_like(acc_ref)

    if base_resident:
        start = pl.multiple_of(k * bk, bk)
        xb = x_ref[0, pl.ds(start, bk), :]          # (bk, F) slice of resident slab
    else:
        xb = x_ref[0]                               # (bk, F) streamed tile

    # bf16 x bf16 MXU matmul with f32 accumulation (no in-kernel upcast).
    acc_ref[...] += jnp.dot(adj_ref[0], xb, preferred_element_type=jnp.float32)

    @pl.when(k == nk - 1)
    def _():
        prod = acc_ref[...]
        if emit_out:
            out_ref[0] = prod.astype(out_ref.dtype)     # next level's base (bf16)
        res_out_ref[...] += coef_ref[t] * prod          # fused coefficient accumulate


def pallas_spmm_level(adj_stack, base_stack, res, coefs, *, emit_out,
                      shared_base, block_m=512, block_k=512):
    """adj_stack[T,Np,Np] (bf16) x base_stack[Tb,Np,F] (bf16); Tb==1 if shared.

    Returns (out[T,Np,F] bf16 or None, res + sum_t coefs[t]*out[t] in f32)."""
    T, Np, Np2 = adj_stack.shape
    Tb, Npb, F = base_stack.shape
    assert Np == Np2 and Npb == Np and Np % 256 == 0, "pad node dim to 256"
    assert Tb == (1 if shared_base else T)
    assert res.shape == (Np, F)

    bm = block_m if Np % block_m == 0 else 256
    bk = block_k if Np % block_k == 0 else 256

    # Keep the (Np, F) base slab VMEM-resident across the whole contraction when
    # it fits comfortably (double-buffered); otherwise stream (bk, F) tiles.
    base_resident = (2 * Np * F * base_stack.dtype.itemsize) <= 8 * 1024 * 1024
    if base_resident:
        x_spec = pl.BlockSpec(
            (1, Np, F),
            (lambda i, t, k: (0, 0, 0)) if shared_base
            else (lambda i, t, k: (t, 0, 0)))
    else:
        x_spec = pl.BlockSpec(
            (1, bk, F),
            (lambda i, t, k: (0, k, 0)) if shared_base
            else (lambda i, t, k: (t, k, 0)))

    in_specs = [
        pl.BlockSpec(memory_space=pltpu.MemorySpace.SMEM),      # coefs (T,) scalar path
        pl.BlockSpec((1, bm, bk), lambda i, t, k: (t, i, k)),   # adjacency tile (bf16)
        x_spec,                                                 # base
        pl.BlockSpec((bm, F), lambda i, t, k: (i, 0)),          # running res (f32)
    ]
    res_spec = pl.BlockSpec((bm, F), lambda i, t, k: (i, 0))
    res_shape = jax.ShapeDtypeStruct((Np, F), jnp.float32)

    if emit_out:
        out_shape = (jax.ShapeDtypeStruct((T, Np, F), jnp.bfloat16), res_shape)
        out_specs = (pl.BlockSpec((1, bm, F), lambda i, t, k: (t, i, 0)), res_spec)
        alias = {3: 1}       # res input aliases res output (in-place accumulator)
    else:
        out_shape = res_shape
        out_specs = res_spec
        alias = {3: 0}

    kernel = functools.partial(_spmm_level_kernel, bk=bk, emit_out=emit_out,
                               base_resident=base_resident)

    # NOTE: no vmem_limit_bytes request -- default scoped budget is ample for
    # these tile sizes and 64 MiB would be the whole physical VMEM on v7x.
    result = pl.pallas_call(
        kernel,
        out_shape=out_shape,
        grid=(Np // bm, T, Np // bk),
        in_specs=in_specs,
        out_specs=out_specs,
        scratch_shapes=[pltpu.VMEM((bm, F), jnp.float32)],
        input_output_aliases=alias,
        compiler_params=pltpu.CompilerParams(
            dimension_semantics=("parallel", "arbitrary", "arbitrary")),
    )(coefs.astype(jnp.float32), adj_stack, base_stack, res.astype(jnp.float32))

    if emit_out:
        out, res_new = result
        return out, res_new
    return None, result


# ----------------------------------------------------------------------------
# PSHGCN forward (hot paths in Pallas, tiny glue in plain XLA)
# ----------------------------------------------------------------------------
def pshgcn_forward(params, adjs, features_list, left, right, mid, lis, lis_t, K):
    # Per-node-type feature projection (bias=False since bns=False) + concat.
    # Tiny matmuls -> plain XLA (Pallas launch overhead would dominate).
    x = jnp.concatenate(
        [feat.astype(jnp.float32) @ w.astype(jnp.float32)
         for w, feat in zip(params["feat_project"], features_list)], axis=0)

    # lin1 + relu + row-normalize fused; input_drop/dropout are identity (eval).
    x = pallas_linear(x, params["lin1_w"], params["lin1_b"],
                      act="relu", normalize=True)

    # Pad the node dim once to a multiple of 256 (zero pad -> exact results,
    # and 256-multiple tiles fill the 256x256 MXUs on v6e/v7x).
    N = x.shape[0]
    Np = ((N + 255) // 256) * 256
    pad = Np - N
    x_pad = jnp.pad(x, ((0, pad), (0, 0))) if pad else x

    # Pad + cast adjacency to bf16 ONCE (0/1 entries are exact in bf16).
    # TODO(synk): on v7x the 0/1 adjacency could be stored as fp8 (e4m3, exact
    # for 0/1) to halve the dominant HBM stream again.
    def _pad_cast(a):
        if pad:
            a = jnp.pad(a, ((0, pad), (0, pad)))
        return a.astype(jnp.bfloat16)

    adjs_p = {key: _pad_cast(v) for key, v in adjs.items()}

    # Stack the per-level adjacencies once per distinct key ordering so both
    # propagation passes reuse the same stacked HBM buffer.
    stack_cache = {}

    def adj_stack_for(adj_keys):
        kt = tuple(adj_keys)
        if kt not in stack_cache:
            stack_cache[kt] = jnp.stack([adjs_p[key] for key in kt], axis=0)
        return stack_cache[kt]

    W = params["W"]

    def propagate(x_in, lis_dict):
        coe = 0
        res = W[coe] * x_in
        coe += 1
        base = x_in[None].astype(jnp.bfloat16)     # level-1 base, shared by terms
        shared = True
        prev_keys = None
        for k in range(1, K + 1):
            keys = lis_dict[k]
            T = len(keys)
            if k == 1:
                adj_keys = list(keys)
            else:
                adj_keys = [key[:2] for key in keys]
                # Reorder previous-level outputs so base index == term index.
                perm = [prev_keys.index(key[2:]) for key in keys]
                if perm != list(range(base.shape[0])):
                    base = jnp.take(base, jnp.asarray(perm, jnp.int32), axis=0)
                shared = False
            out, res = pallas_spmm_level(
                adj_stack_for(adj_keys), base, res, W[coe:coe + T],
                emit_out=(k < K), shared_base=shared)
            coe += T
            if out is not None:
                base = out
            prev_keys = keys
        return res

    x_pad = propagate(x_pad, lis)        # first polynomial pass
    res = propagate(x_pad, lis_t)        # second pass; coefficients restart at W[0]
    res = res[:N] if pad else res

    logits = pallas_linear(res, params["lin2_w"], params["lin2_b"])

    # DistMult decoder (E x C x C with C tiny) -> plain XLA.
    left_emb = jnp.take(logits, left, axis=0)
    right_emb = jnp.take(logits, right, axis=0)
    thW = jnp.take(params["distmult_W"], mid, axis=0)
    return jnp.einsum("ec,ecd,ed->e", left_emb, thW, right_emb)


# ----------------------------------------------------------------------------
# Deterministic parameter / input construction and smoke test
# ----------------------------------------------------------------------------
if __name__ == "__main__":
    key = jax.random.PRNGKey(0)
    keys = jax.random.split(key, 24)
    ki = iter(keys)

    in_dims = [12, 8, 10]          # per-node-type feature dims
    n_nodes = [40, 48, 40]         # per-node-type node counts (N = 128)
    N = sum(n_nodes)
    emb_dim = 128                  # lane-dense hidden dims (>= 128)
    h_dim = 128
    num_classes = 8
    K = 2
    E = 16                         # number of (left, right) link-prediction pairs

    # polynomial term index structure (keys into `adjs` / previous level)
    lis = {1: ["ab", "ba"], 2: ["abba", "baab"]}
    lis_t = {1: ["ba", "ab"], 2: ["baab", "abba"]}

    params = {}
    params["feat_project"] = [
        jax.random.normal(next(ki), (d, emb_dim), jnp.float32) / jnp.sqrt(float(d))
        for d in in_dims
    ]
    params["lin1_w"] = (jax.random.normal(next(ki), (emb_dim, h_dim), jnp.float32)
                        / jnp.sqrt(float(emb_dim)))
    params["lin1_b"] = 0.01 * jax.random.normal(next(ki), (h_dim,), jnp.float32)
    params["lin2_w"] = (jax.random.normal(next(ki), (h_dim, num_classes), jnp.float32)
                        / jnp.sqrt(float(h_dim)))
    params["lin2_b"] = 0.01 * jax.random.normal(next(ki), (num_classes,), jnp.float32)

    # init_coe(): uniform(-bound, bound) then L1-normalized
    coe_num = 1 + len(lis[1]) + sum(len(lis[k]) for k in range(2, K + 1))
    bound = (3.0 / coe_num) ** 0.5
    temp = jax.random.uniform(next(ki), (coe_num,), jnp.float32, -bound, bound)
    params["W"] = temp / jnp.sum(jnp.abs(temp))

    # DistMult(2, num_classes), xavier_normal_ with gain 1.414
    gain = 1.414
    xav_std = gain * (2.0 / (num_classes + num_classes)) ** 0.5
    params["distmult_W"] = xav_std * jax.random.normal(
        next(ki), (2, num_classes, num_classes), jnp.float32)

    features_list = [
        jax.random.normal(next(ki), (n, d), jnp.float32)
        for n, d in zip(n_nodes, in_dims)
    ]
    # dense adjacencies over the concatenated node set (0/1 values)
    adjs = {
        "ab": (jax.random.uniform(next(ki), (N, N)) < 0.05).astype(jnp.float32),
        "ba": (jax.random.uniform(next(ki), (N, N)) < 0.05).astype(jnp.float32),
    }
    left = jax.random.randint(next(ki), (E,), 0, N)
    right = jax.random.randint(next(ki), (E,), 0, N)
    mid = jax.random.randint(next(ki), (E,), 0, 2)

    forward = jax.jit(functools.partial(pshgcn_forward, lis=lis, lis_t=lis_t, K=K))
    scores = forward(params, adjs, features_list, left, right, mid)
    jax.block_until_ready(scores)
    assert scores.shape == (E,)
    assert bool(jnp.all(jnp.isfinite(scores)))
    print("KERNEL_OK")
</pallas_src>

<mosaic_0001>
module attributes {stable_mosaic.version = 11 : i64} {
  func.func @_linear_kernel(%arg0: i32, %arg1: memref<128x128xf32, #tpu.memory_space<vmem>>, %arg2: memref<128x128xf32, #tpu.memory_space<vmem>>, %arg3: memref<1x128xf32, #tpu.memory_space<vmem>>, %arg4: memref<128x128xf32, #tpu.memory_space<vmem>>) attributes {dimension_semantics = [#tpu.dimension_semantics<parallel>], iteration_bounds = array<i64: 1>, scalar_prefetch = 0 : i64, scratch_operands = 0 : i64, tpu.core_type = #tpu.core_type<tc>, window_params = [{transform_indices = @transform_0, window_bounds = array<i64: 128, 128>}, {pipeline_mode = #tpu.pipeline_mode<synchronous>, transform_indices = @transform_1, window_bounds = array<i64: 128, 128>}, {pipeline_mode = #tpu.pipeline_mode<synchronous>, transform_indices = @transform_2, window_bounds = array<i64: 1, 128>}, {transform_indices = @transform_3, window_bounds = array<i64: 128, 128>}]} {
    %c0 = arith.constant 0 : index
    %c0_0 = arith.constant 0 : index
    %0 = vector.load %arg1[%c0, %c0_0] : memref<128x128xf32, #tpu.memory_space<vmem>>, vector<128x128xf32>
    %c0_1 = arith.constant 0 : index
    %c0_2 = arith.constant 0 : index
    %1 = vector.load %arg2[%c0_1, %c0_2] : memref<128x128xf32, #tpu.memory_space<vmem>>, vector<128x128xf32>
    %cst = arith.constant dense<0.000000e+00> : vector<128x128xf32>
    %2 = tpu.matmul %0, %1, %cst {dimension_numbers = #tpu.dot_dimension_numbers<[1], [0], [0], [1], [0, 0, 1, 1], [], []>} : vector<128x128xf32>, vector<128x128xf32>, vector<128x128xf32> -> vector<128x128xf32>
    %c0_3 = arith.constant 0 : index
    %c0_4 = arith.constant 0 : index
    %3 = vector.load %arg3[%c0_3, %c0_4] : memref<1x128xf32, #tpu.memory_space<vmem>>, vector<1x128xf32>
    %4 = vector.broadcast %3 : vector<1x128xf32> to vector<128x128xf32>
    %5 = arith.addf %2, %4 : vector<128x128xf32>
    %cst_5 = arith.constant 0.000000e+00 : f32
    %6 = vector.broadcast %cst_5 : f32 to vector<128x128xf32>
    %7 = arith.maximumf %5, %6 : vector<128x128xf32>
    %cst_6 = arith.constant dense<0.000000e+00> : vector<128xf32>
    %8 = vector.multi_reduction <add>, %7, %cst_6 [1] : vector<128x128xf32> to vector<128xf32>
    %9 = vector.shape_cast %8 : vector<128xf32> to vector<128x1xf32>
    %cst_7 = arith.constant 1.280000e+02 : f32
    %10 = vector.broadcast %cst_7 : f32 to vector<128x1xf32>
    %11 = arith.divf %9, %10 : vector<128x1xf32>
    %12 = vector.broadcast %11 : vector<128x1xf32> to vector<128x128xf32>
    %13 = arith.subf %7, %12 : vector<128x128xf32>
    %14 = arith.mulf %13, %13 : vector<128x128xf32>
    %cst_8 = arith.constant dense<0.000000e+00> : vector<128xf32>
    %15 = vector.multi_reduction <add>, %14, %cst_8 [1] : vector<128x128xf32> to vector<128xf32>
    %16 = vector.shape_cast %15 : vector<128xf32> to vector<128x1xf32>
    %cst_9 = arith.constant 1.270000e+02 : f32
    %17 = vector.broadcast %cst_9 : f32 to vector<128x1xf32>
    %18 = arith.divf %16, %17 : vector<128x1xf32>
    %19 = math.rsqrt %18 : vector<128x1xf32>
    %20 = vector.broadcast %11 : vector<128x1xf32> to vector<128x128xf32>
    %21 = arith.subf %7, %20 : vector<128x128xf32>
    %22 = vector.broadcast %19 : vector<128x1xf32> to vector<128x128xf32>
    %23 = arith.mulf %21, %22 : vector<128x128xf32>
    %cst_10 = arith.constant 0.000000e+00 : f32
    %24 = vector.broadcast %cst_10 : f32 to vector<128x1xf32>
    %25 = arith.cmpf ogt, %18, %24 : vector<128x1xf32>
    %cst_11 = arith.constant 0.000000e+00 : f32
    %26 = vector.broadcast %cst_11 : f32 to vector<128x128xf32>
    %27 = vector.shape_cast %25 : vector<128x1xi1> to vector<128x1xi1>
    %28 = vector.broadcast %27 : vector<128x1xi1> to vector<128x128xi1>
    %29 = arith.select %28, %23, %26 : vector<128x128xi1>, vector<128x128xf32>
    %c0_12 = arith.constant 0 : index
    %c0_13 = arith.constant 0 : index
    %30 = vector.load %arg4[%c0_12, %c0_13] : memref<128x128xf32, #tpu.memory_space<vmem>>, vector<128x128xf32>
    tpu.vector_store %arg4[%c0_12, %c0_13], %29 {strides = array<i32>} : memref<128x128xf32, #tpu.memory_space<vmem>>, vector<128x128xf32>,
    return
  }
  func.func @transform_0(%arg0: i32) -> (i32, i32) {
    %c0_i32 = arith.constant 0 : i32
    %c0_i32_0 = arith.constant 0 : i32
    return %arg0, %c0_i32 : i32, i32
  }
  func.func @transform_1(%arg0: i32) -> (i32, i32) {
    %c0_i32 = arith.constant 0 : i32
    %c0_i32_0 = arith.constant 0 : i32
    %c0_i32_1 = arith.constant 0 : i32
    return %c0_i32, %c0_i32_0 : i32, i32
  }
  func.func @transform_2(%arg0: i32) -> (i32, i32) {
    %c0_i32 = arith.constant 0 : i32
    %c0_i32_0 = arith.constant 0 : i32
    %c0_i32_1 = arith.constant 0 : i32
    return %c0_i32, %c0_i32_0 : i32, i32
  }
  func.func @transform_3(%arg0: i32) -> (i32, i32) {
    %c0_i32 = arith.constant 0 : i32
    %c0_i32_0 = arith.constant 0 : i32
    return %arg0, %c0_i32 : i32, i32
  }
}

module attributes {stable_mosaic.version = 11 : i64} {
  func.func @_spmm_level_kernel(%arg0: i32, %arg1: i32, %arg2: i32, %arg3: memref<2xf32, #tpu.memory_space<smem>>, %arg4: memref<1x256x256xbf16, #tpu.memory_space<vmem>>, %arg5: memref<1x256x128xbf16, #tpu.memory_space<vmem>>, %arg6: memref<256x128xf32, #tpu.memory_space<vmem>>, %arg7: memref<1x256x128xbf16, #tpu.memory_space<vmem>>, %arg8: memref<256x128xf32, #tpu.memory_space<vmem>>, %arg9: memref<256x128xf32, #tpu.memory_space<vmem>>) attributes {dimension_semantics = [#tpu.dimension_semantics<parallel>, #tpu.dimension_semantics<arbitrary>, #tpu.dimension_semantics<arbitrary>], iteration_bounds = array<i64: 1, 2, 1>, scalar_prefetch = 0 : i64, scratch_operands = 1 : i64, tpu.core_type = #tpu.core_type<tc>, window_params = [{transform_indices = @transform_0, window_bounds = array<i64: 2>}, {transform_indices = @transform_1, window_bounds = array<i64: 1, 256, 256>}, {pipeline_mode = #tpu.pipeline_mode<synchronous>, transform_indices = @transform_2, window_bounds = array<i64: 1, 256, 128>}, {transform_indices = @transform_3, window_bounds = array<i64: 256, 128>}, {transform_indices = @transform_4, window_bounds = array<i64: 1, 256, 128>}, {transform_indices = @transform_5, window_bounds = array<i64: 256, 128>}]} {
    %c0_i32 = arith.constant 0 : i32
    %0 = arith.cmpi eq, %arg1, %c0_i32 : i32
    %c0_i32_0 = arith.constant 0 : i32
    %1 = arith.cmpi eq, %arg2, %c0_i32_0 : i32
    %2 = arith.andi %0, %1 : i1
    %3 = arith.extui %2 : i1 to i32
    %c0_i32_1 = arith.constant 0 : i32
    %4 = arith.cmpi ne, %3, %c0_i32_1 : i32
    scf.if %4 {
      %c0_14 = arith.constant 0 : index
      %c0_15 = arith.constant 0 : index
      %22 = vector.load %arg6[%c0_14, %c0_15] : memref<256x128xf32, #tpu.memory_space<vmem>>, vector<256x128xf32>
      %c0_16 = arith.constant 0 : index
      %c0_17 = arith.constant 0 : index
      %23 = vector.load %arg8[%c0_16, %c0_17] : memref<256x128xf32, #tpu.memory_space<vmem>>, vector<256x128xf32>
      tpu.vector_store %arg8[%c0_16, %c0_17], %22 {strides = array<i32>} : memref<256x128xf32, #tpu.memory_space<vmem>>, vector<256x128xf32>,
    } else {
    }
    %c0_i32_2 = arith.constant 0 : i32
    %5 = arith.cmpi eq, %arg2, %c0_i32_2 : i32
    %6 = arith.extui %5 : i1 to i32
    %c0_i32_3 = arith.constant 0 : i32
    %7 = arith.cmpi ne, %6, %c0_i32_3 : i32
    scf.if %7 {
      %cst_14 = arith.constant 0.000000e+00 : f32
      %22 = vector.broadcast %cst_14 : f32 to vector<256x128xf32>
      %c0_15 = arith.constant 0 : index
      %c0_16 = arith.constant 0 : index
      %23 = vector.load %arg9[%c0_15, %c0_16] : memref<256x128xf32, #tpu.memory_space<vmem>>, vector<256x128xf32>
      tpu.vector_store %arg9[%c0_15, %c0_16], %22 {strides = array<i32>} : memref<256x128xf32, #tpu.memory_space<vmem>>, vector<256x128xf32>,
    } else {
    }
    %c256_i32 = arith.constant 256 : i32
    %8 = arith.muli %arg2, %c256_i32 : i32
    %9 = tpu.assume_multiple %8, 256 : i32
    %c0 = arith.constant 0 : index
    %10 = arith.index_cast %9 : i32 to index
    %c0_4 = arith.constant 0 : index
    %11 = vector.load %arg5[%c0, %10, %c0_4] : memref<1x256x128xbf16, #tpu.memory_space<vmem>>, vector<1x256x128xbf16>
    %12 = vector.shape_cast %11 : vector<1x256x128xbf16> to vector<256x128xbf16>
    %c0_5 = arith.constant 0 : index
    %c0_6 = arith.constant 0 : index
    %13 = vector.load %arg9[%c0_5, %c0_6] : memref<256x128xf32, #tpu.memory_space<vmem>>, vector<256x128xf32>
    %c0_7 = arith.constant 0 : index
    %c0_8 = arith.constant 0 : index
    %c0_9 = arith.constant 0 : index
    %14 = vector.load %arg4[%c0_7, %c0_8, %c0_9] : memref<1x256x256xbf16, #tpu.memory_space<vmem>>, vector<1x256x256xbf16>
    %15 = vector.shape_cast %14 : vector<1x256x256xbf16> to vector<256x256xbf16>
    %cst = arith.constant dense<0.000000e+00> : vector<256x128xf32>
    %16 = tpu.matmul %15, %12, %cst {dimension_numbers = #tpu.dot_dimension_numbers<[1], [0], [0], [1], [0, 0, 1, 1], [], []>} : vector<256x256xbf16>, vector<256x128xbf16>, vector<256x128xf32> -> vector<256x128xf32>
    %17 = arith.addf %13, %16 : vector<256x128xf32>
    %c0_10 = arith.constant 0 : index
    %c0_11 = arith.constant 0 : index
    %18 = vector.load %arg9[%c0_10, %c0_11] : memref<256x128xf32, #tpu.memory_space<vmem>>, vector<256x128xf32>
    tpu.vector_store %arg9[%c0_10, %c0_11], %17 {strides = array<i32>} : memref<256x128xf32, #tpu.memory_space<vmem>>, vector<256x128xf32>,
    %c0_i32_12 = arith.constant 0 : i32
    %19 = arith.cmpi eq, %arg2, %c0_i32_12 : i32
    %20 = arith.extui %19 : i1 to i32
    %c0_i32_13 = arith.constant 0 : i32
    %21 = arith.cmpi ne, %20, %c0_i32_13 : i32
    scf.if %21 {
      %c0_14 = arith.constant 0 : index
      %c0_15 = arith.constant 0 : index
      %22 = vector.load %arg9[%c0_14, %c0_15] : memref<256x128xf32, #tpu.memory_space<vmem>>, vector<256x128xf32>
      %23 = arith.truncf %22 : vector<256x128xf32> to vector<256x128xbf16>
      %c0_16 = arith.constant 0 : index
      %c0_17 = arith.constant 0 : index
      %c0_18 = arith.constant 0 : index
      %24 = vector.load %arg7[%c0_16, %c0_17, %c0_18] : memref<1x256x128xbf16, #tpu.memory_space<vmem>>, vector<1x256x128xbf16>
      %25 = vector.shape_cast %24 : vector<1x256x128xbf16> to vector<256x128xbf16>
      %26 = vector.shape_cast %23 : vector<256x128xbf16> to vector<1x256x128xbf16>
      tpu.vector_store %arg7[%c0_16, %c0_17, %c0_18], %26 {strides = array<i32>} : memref<1x256x128xbf16, #tpu.memory_space<vmem>>, vector<1x256x128xbf16>,
      %c0_19 = arith.constant 0 : index
      %c0_20 = arith.constant 0 : index
      %27 = vector.load %arg8[%c0_19, %c0_20] : memref<256x128xf32, #tpu.memory_space<vmem>>, vector<256x128xf32>
      %28 = arith.index_cast %arg1 : i32 to index
      %29 = memref.load %arg3[%28] : memref<2xf32, #tpu.memory_space<smem>>
      %30 = vector.broadcast %29 : f32 to vector<256x128xf32>
      %31 = arith.mulf %30, %22 : vector<256x128xf32>
      %32 = arith.addf %27, %31 : vector<256x128xf32>
      %c0_21 = arith.constant 0 : index
      %c0_22 = arith.constant 0 : index
      %33 = vector.load %arg8[%c0_21, %c0_22] : memref<256x128xf32, #tpu.memory_space<vmem>>, vector<256x128xf32>
      tpu.vector_store %arg8[%c0_21, %c0_22], %32 {strides = array<i32>} : memref<256x128xf32, #tpu.memory_space<vmem>>, vector<256x128xf32>,
    } else {
    }
    return
  }
  func.func @transform_0(%arg0: i32, %arg1: i32, %arg2: i32) -> i32 {
    %c0_i32 = arith.constant 0 : i32
    %c0_i32_0 = arith.constant 0 : i32
    return %c0_i32 : i32
  }
  func.func @transform_1(%arg0: i32, %arg1: i32, %arg2: i32) -> (i32, i32, i32) {
    %c0_i32 = arith.constant 0 : i32
    return %arg1, %arg0, %arg2 : i32, i32, i32
  }
  func.func @transform_2(%arg0: i32, %arg1: i32, %arg2: i32) -> (i32, i32, i32) {
    %c0_i32 = arith.constant 0 : i32
    %c0_i32_0 = arith.constant 0 : i32
    %c0_i32_1 = arith.constant 0 : i32
    %c0_i32_2 = arith.constant 0 : i32
    return %c0_i32, %c0_i32_0, %c0_i32_1 : i32, i32, i32
  }
  func.func @transform_3(%arg0: i32, %arg1: i32, %arg2: i32) -> (i32, i32) {
    %c0_i32 = arith.constant 0 : i32
    %c0_i32_0 = arith.constant 0 : i32
    return %arg0, %c0_i32 : i32, i32
  }
  func.func @transform_4(%arg0: i32, %arg1: i32, %arg2: i32) -> (i32, i32, i32) {
    %c0_i32 = arith.constant 0 : i32
    %c0_i32_0 = arith.constant 0 : i32
    return %arg1, %arg0, %c0_i32 : i32, i32, i32
  }
  func.func @transform_5(%arg0: i32, %arg1: i32, %arg2: i32) -> (i32, i32) {
    %c0_i32 = arith.constant 0 : i32
    %c0_i32_0 = arith.constant 0 : i32
    return %arg0, %c0_i32 : i32, i32
  }
}

module attributes {stable_mosaic.version = 11 : i64} {
  func.func @_spmm_level_kernel(%arg0: i32, %arg1: i32, %arg2: i32, %arg3: memref<2xf32, #tpu.memory_space<smem>>, %arg4: memref<1x256x256xbf16, #tpu.memory_space<vmem>>, %arg5: memref<1x256x128xbf16, #tpu.memory_space<vmem>>, %arg6: memref<256x128xf32, #tpu.memory_space<vmem>>, %arg7: memref<256x128xf32, #tpu.memory_space<vmem>>, %arg8: memref<256x128xf32, #tpu.memory_space<vmem>>) attributes {dimension_semantics = [#tpu.dimension_semantics<parallel>, #tpu.dimension_semantics<arbitrary>, #tpu.dimension_semantics<arbitrary>], iteration_bounds = array<i64: 1, 2, 1>, scalar_prefetch = 0 : i64, scratch_operands = 1 : i64, tpu.core_type = #tpu.core_type<tc>, window_params = [{transform_indices = @transform_0, window_bounds = array<i64: 2>}, {transform_indices = @transform_1, window_bounds = array<i64: 1, 256, 256>}, {transform_indices = @transform_2, window_bounds = array<i64: 1, 256, 128>}, {transform_indices = @transform_3, window_bounds = array<i64: 256, 128>}, {transform_indices = @transform_4, window_bounds = array<i64: 256, 128>}]} {
    %c0_i32 = arith.constant 0 : i32
    %0 = arith.cmpi eq, %arg1, %c0_i32 : i32
    %c0_i32_0 = arith.constant 0 : i32
    %1 = arith.cmpi eq, %arg2, %c0_i32_0 : i32
    %2 = arith.andi %0, %1 : i1
    %3 = arith.extui %2 : i1 to i32
    %c0_i32_1 = arith.constant 0 : i32
    %4 = arith.cmpi ne, %3, %c0_i32_1 : i32
    scf.if %4 {
      %c0_14 = arith.constant 0 : index
      %c0_15 = arith.constant 0 : index
      %22 = vector.load %arg6[%c0_14, %c0_15] : memref<256x128xf32, #tpu.memory_space<vmem>>, vector<256x128xf32>
      %c0_16 = arith.constant 0 : index
      %c0_17 = arith.constant 0 : index
      %23 = vector.load %arg7[%c0_16, %c0_17] : memref<256x128xf32, #tpu.memory_space<vmem>>, vector<256x128xf32>
      tpu.vector_store %arg7[%c0_16, %c0_17], %22 {strides = array<i32>} : memref<256x128xf32, #tpu.memory_space<vmem>>, vector<256x128xf32>,
    } else {
    }
    %c0_i32_2 = arith.constant 0 : i32
    %5 = arith.cmpi eq, %arg2, %c0_i32_2 : i32
    %6 = arith.extui %5 : i1 to i32
    %c0_i32_3 = arith.constant 0 : i32
    %7 = arith.cmpi ne, %6, %c0_i32_3 : i32
    scf.if %7 {
      %cst_14 = arith.constant 0.000000e+00 : f32
      %22 = vector.broadcast %cst_14 : f32 to vector<256x128xf32>
      %c0_15 = arith.constant 0 : index
      %c0_16 = arith.constant 0 : index
      %23 = vector.load %arg8[%c0_15, %c0_16] : memref<256x128xf32, #tpu.memory_space<vmem>>, vector<256x128xf32>
      tpu.vector_store %arg8[%c0_15, %c0_16], %22 {strides = array<i32>} : memref<256x128xf32, #tpu.memory_space<vmem>>, vector<256x128xf32>,
    } else {
    }
    %c256_i32 = arith.constant 256 : i32
    %8 = arith.muli %arg2, %c256_i32 : i32
    %9 = tpu.assume_multiple %8, 256 : i32
    %c0 = arith.constant 0 : index
    %10 = arith.index_cast %9 : i32 to index
    %c0_4 = arith.constant 0 : index
    %11 = vector.load %arg5[%c0, %10, %c0_4] : memref<1x256x128xbf16, #tpu.memory_space<vmem>>, vector<1x256x128xbf16>
    %12 = vector.shape_cast %11 : vector<1x256x128xbf16> to vector<256x128xbf16>
    %c0_5 = arith.constant 0 : index
    %c0_6 = arith.constant 0 : index
    %13 = vector.load %arg8[%c0_5, %c0_6] : memref<256x128xf32, #tpu.memory_space<vmem>>, vector<256x128xf32>
    %c0_7 = arith.constant 0 : index
    %c0_8 = arith.constant 0 : index
    %c0_9 = arith.constant 0 : index
    %14 = vector.load %arg4[%c0_7, %c0_8, %c0_9] : memref<1x256x256xbf16, #tpu.memory_space<vmem>>, vector<1x256x256xbf16>
    %15 = vector.shape_cast %14 : vector<1x256x256xbf16> to vector<256x256xbf16>
    %cst = arith.constant dense<0.000000e+00> : vector<256x128xf32>
    %16 = tpu.matmul %15, %12, %cst {dimension_numbers = #tpu.dot_dimension_numbers<[1], [0], [0], [1], [0, 0, 1, 1], [], []>} : vector<256x256xbf16>, vector<256x128xbf16>, vector<256x128xf32> -> vector<256x128xf32>
    %17 = arith.addf %13, %16 : vector<256x128xf32>
    %c0_10 = arith.constant 0 : index
    %c0_11 = arith.constant 0 : index
    %18 = vector.load %arg8[%c0_10, %c0_11] : memref<256x128xf32, #tpu.memory_space<vmem>>, vector<256x128xf32>
    tpu.vector_store %arg8[%c0_10, %c0_11], %17 {strides = array<i32>} : memref<256x128xf32, #tpu.memory_space<vmem>>, vector<256x128xf32>,
    %c0_i32_12 = arith.constant 0 : i32
    %19 = arith.cmpi eq, %arg2, %c0_i32_12 : i32
    %20 = arith.extui %19 : i1 to i32
    %c0_i32_13 = arith.constant 0 : i32
    %21 = arith.cmpi ne, %20, %c0_i32_13 : i32
    scf.if %21 {
      %c0_14 = arith.constant 0 : index
      %c0_15 = arith.constant 0 : index
      %22 = vector.load %arg8[%c0_14, %c0_15] : memref<256x128xf32, #tpu.memory_space<vmem>>, vector<256x128xf32>
      %c0_16 = arith.constant 0 : index
      %c0_17 = arith.constant 0 : index
      %23 = vector.load %arg7[%c0_16, %c0_17] : memref<256x128xf32, #tpu.memory_space<vmem>>, vector<256x128xf32>
      %24 = arith.index_cast %arg1 : i32 to index
      %25 = memref.load %arg3[%24] : memref<2xf32, #tpu.memory_space<smem>>
      %26 = vector.broadcast %25 : f32 to vector<256x128xf32>
      %27 = arith.mulf %26, %22 : vector<256x128xf32>
      %28 = arith.addf %23, %27 : vector<256x128xf32>
      %c0_18 = arith.constant 0 : index
      %c0_19 = arith.constant 0 : index
      %29 = vector.load %arg7[%c0_18, %c0_19] : memref<256x128xf32, #tpu.memory_space<vmem>>, vector<256x128xf32>
      tpu.vector_store %arg7[%c0_18, %c0_19], %28 {strides = array<i32>} : memref<256x128xf32, #tpu.memory_space<vmem>>, vector<256x128xf32>,
    } else {
    }
    return
  }
  func.func @transform_0(%arg0: i32, %arg1: i32, %arg2: i32) -> i32 {
    %c0_i32 = arith.constant 0 : i32
    %c0_i32_0 = arith.constant 0 : i32
    return %c0_i32 : i32
  }
  func.func @transform_1(%arg0: i32, %arg1: i32, %arg2: i32) -> (i32, i32, i32) {
    %c0_i32 = arith.constant 0 : i32
    return %arg1, %arg0, %arg2 : i32, i32, i32
  }
  func.func @transform_2(%arg0: i32, %arg1: i32, %arg2: i32) -> (i32, i32, i32) {
    %c0_i32 = arith.constant 0 : i32
    %c0_i32_0 = arith.constant 0 : i32
    %c0_i32_1 = arith.constant 0 : i32
    return %arg1, %c0_i32, %c0_i32_0 : i32, i32, i32
  }
  func.func @transform_3(%arg0: i32, %arg1: i32, %arg2: i32) -> (i32, i32) {
    %c0_i32 = arith.constant 0 : i32
    %c0_i32_0 = arith.constant 0 : i32
    return %arg0, %c0_i32 : i32, i32
  }
  func.func @transform_4(%arg0: i32, %arg1: i32, %arg2: i32) -> (i32, i32) {
    %c0_i32 = arith.constant 0 : i32
    %c0_i32_0 = arith.constant 0 : i32
    return %arg0, %c0_i32 : i32, i32
  }
}

module attributes {stable_mosaic.version = 11 : i64} {
  func.func @_linear_kernel(%arg0: i32, %arg1: memref<128x128xf32, #tpu.memory_space<vmem>>, %arg2: memref<128x8xf32, #tpu.memory_space<vmem>>, %arg3: memref<1x8xf32, #tpu.memory_space<vmem>>, %arg4: memref<128x8xf32, #tpu.memory_space<vmem>>) attributes {dimension_semantics = [#tpu.dimension_semantics<parallel>], iteration_bounds = array<i64: 1>, scalar_prefetch = 0 : i64, scratch_operands = 0 : i64, tpu.core_type = #tpu.core_type<tc>, window_params = [{transform_indices = @transform_0, window_bounds = array<i64: 128, 128>}, {pipeline_mode = #tpu.pipeline_mode<synchronous>, transform_indices = @transform_1, window_bounds = array<i64: 128, 8>}, {pipeline_mode = #tpu.pipeline_mode<synchronous>, transform_indices = @transform_2, window_bounds = array<i64: 1, 8>}, {transform_indices = @transform_3, window_bounds = array<i64: 128, 8>}]} {
    %c0 = arith.constant 0 : index
    %c0_0 = arith.constant 0 : index
    %0 = vector.load %arg1[%c0, %c0_0] : memref<128x128xf32, #tpu.memory_space<vmem>>, vector<128x128xf32>
    %c0_1 = arith.constant 0 : index
    %c0_2 = arith.constant 0 : index
    %1 = vector.load %arg2[%c0_1, %c0_2] : memref<128x8xf32, #tpu.memory_space<vmem>>, vector<128x8xf32>
    %cst = arith.constant dense<0.000000e+00> : vector<128x8xf32>
    %2 = tpu.matmul %0, %1, %cst {dimension_numbers = #tpu.dot_dimension_numbers<[1], [0], [0], [1], [0, 0, 1, 1], [], []>} : vector<128x128xf32>, vector<128x8xf32>, vector<128x8xf32> -> vector<128x8xf32>
    %c0_3 = arith.constant 0 : index
    %c0_4 = arith.constant 0 : index
    %3 = vector.load %arg3[%c0_3, %c0_4] : memref<1x8xf32, #tpu.memory_space<vmem>>, vector<1x8xf32>
    %4 = vector.broadcast %3 : vector<1x8xf32> to vector<128x8xf32>
    %5 = arith.addf %2, %4 : vector<128x8xf32>
    %c0_5 = arith.constant 0 : index
    %c0_6 = arith.constant 0 : index
    %6 = vector.load %arg4[%c0_5, %c0_6] : memref<128x8xf32, #tpu.memory_space<vmem>>, vector<128x8xf32>
    tpu.vector_store %arg4[%c0_5, %c0_6], %5 {strides = array<i32>} : memref<128x8xf32, #tpu.memory_space<vmem>>, vector<128x8xf32>,
    return
  }
  func.func @transform_0(%arg0: i32) -> (i32, i32) {
    %c0_i32 = arith.constant 0 : i32
    %c0_i32_0 = arith.constant 0 : i32
    return %arg0, %c0_i32 : i32, i32
  }
  func.func @transform_1(%arg0: i32) -> (i32, i32) {
    %c0_i32 = arith.constant 0 : i32
    %c0_i32_0 = arith.constant 0 : i32
    %c0_i32_1 = arith.constant 0 : i32
    return %c0_i32, %c0_i32_0 : i32, i32
  }
  func.func @transform_2(%arg0: i32) -> (i32, i32) {
    %c0_i32 = arith.constant 0 : i32
    %c0_i32_0 = arith.constant 0 : i32
    %c0_i32_1 = arith.constant 0 : i32
    return %c0_i32, %c0_i32_0 : i32, i32
  }
  func.func @transform_3(%arg0: i32) -> (i32, i32) {
    %c0_i32 = arith.constant 0 : i32
    %c0_i32_0 = arith.constant 0 : i32
    return %arg0, %c0_i32 : i32, i32
  }
}

</mosaic_0001>

<bundles_post_ra>
// kernel: pshgcn_forward.6
= control target key start
LH: loop header
LB: loop body
LE: loop exit
PB: predicated region body
PF: predicated region fallthrough
CT: control target
= control target key end

     0   :  { %s960_s1 = inlined_call_operand.vmem [shape: f32[128,128], index: 1, kind: input, shape index: {}]   ;;  %s961_s0 = inlined_call_operand.vmem [shape: f32[128,128], index: 0, kind: input, shape index: {}]   ;;  %s962_s2 = inlined_call_operand.vmem [shape: f32[1,128], index: 2, kind: input, shape index: {}]   ;;  %s963_s3 = inlined_call_operand.vmem [shape: f32[128,128], index: 3, kind: output, shape index: {}]  }
   0x1   :  { %v45_v0 = vld [vmem:[%s960_s1 + $0x78] sm:$0xff]  ;;  %v44_v1 = vld [vmem:[%s960_s1 + $0x70] sm:$0xff]  ;;  %v43_v2 = vld [vmem:[%s960_s1 + $0x68] sm:$0xff] }
   0x2   :  { %493 = vmatprep.subr.mxu0 %v45_v0  ;;  %549 = vmatprep.subr.mxu1 %v45_v0  ;;  %v42_v3 = vld [vmem:[%s960_s1 + $0x60] sm:$0xff]  ;;  %v41_v4 = vld [vmem:[%s960_s1 + $0x58] sm:$0xff]  ;;  %v40_v5 = vld [vmem:[%s960_s1 + $0x50] sm:$0xff] }
   0x3   :  { %494 = vmatpush3.msra.mxu0 %v45_v0  ;;  %565 = vmatpush3.msra.mxu1 %v45_v0  ;;  %v39_v6 = vld [vmem:[%s960_s1 + $0x48] sm:$0xff]  ;;  %v38_v7 = vld [vmem:[%s960_s1 + $0x40] sm:$0xff]  ;;  %v37_v8 = vld [vmem:[%s960_s1 + $0x38] sm:$0xff] }
   0x4   :  { %495 = vmatprep.subr.mxu0 %v44_v1  ;;  %550 = vmatprep.subr.mxu1 %v44_v1  ;;  %v36_v9 = vld [vmem:[%s960_s1 + $0x30] sm:$0xff]  ;;  %v35_v10 = vld [vmem:[%s960_s1 + $0x28] sm:$0xff]  ;;  %v34_v11 = vld [vmem:[%s960_s1 + $0x20] sm:$0xff] }
   0x5   :  { %496 = vmatpush3.msra.mxu0 %v44_v1  ;;  %566 = vmatpush3.msra.mxu1 %v44_v1  ;;  %v33_v12 = vld [vmem:[%s960_s1 + $0x18] sm:$0xff]  ;;  %v32_v13 = vld [vmem:[%s960_s1 + $0x10] sm:$0xff]  ;;  %v31_v14 = vld [vmem:[%s960_s1 + $0x8] sm:$0xff] }
   0x6   :  { %497 = vmatprep.subr.mxu0 %v43_v2  ;;  %551 = vmatprep.subr.mxu1 %v43_v2  ;;  %v30_v15 = vld [vmem:[%s960_s1] sm:$0xff]  ;;  %v15_v18 = vld [vmem:[%s961_s0 + $0x8] sm:$0xff]  ;;  %v16_v20 = vld [vmem:[%s961_s0 + $0x10] sm:$0xff] }
   0x7   :  { %498 = vmatpush3.msra.mxu0 %v43_v2  ;;  %567 = vmatpush3.msra.mxu1 %v43_v2  ;;  %v14_v16 = vld [vmem:[%s961_s0] sm:$0xff]  ;;  %v23_v19 = vld [vmem:[%s961_s0 + $0x48] sm:$0xff]  ;;  %v24_v21 = vld [vmem:[%s961_s0 + $0x50] sm:$0xff] }
   0x8   :  { %499 = vmatprep.subr.mxu0 %v42_v3  ;;  %552 = vmatprep.subr.mxu1 %v42_v3  ;;  %v22_v17 = vld [vmem:[%s961_s0 + $0x40] sm:$0xff]  ;;  %v17_v22 = vld [vmem:[%s961_s0 + $0x18] sm:$0xff]  ;;  %v19_v26 = vld [vmem:[%s961_s0 + $0x28] sm:$0xff] }
   0x9   :  { %500 = vmatpush3.msra.mxu0 %v42_v3  ;;  %568 = vmatpush3.msra.mxu1 %v42_v3  ;;  %v25_v23 = vld [vmem:[%s961_s0 + $0x58] sm:$0xff]  ;;  %v18_v24 = vld [vmem:[%s961_s0 + $0x20] sm:$0xff]  ;;  %v27_v27 = vld [vmem:[%s961_s0 + $0x68] sm:$0xff] }
   0xa   :  { %501 = vmatprep.subr.mxu0 %v41_v4  ;;  %553 = vmatprep.subr.mxu1 %v41_v4  ;;  %v26_v25 = vld [vmem:[%s961_s0 + $0x60] sm:$0xff]  ;;  %v20_v28 = vld [vmem:[%s961_s0 + $0x30] sm:$0xff]  ;;  %v21_v30 = vld [vmem:[%s961_s0 + $0x38] sm:$0xff] }
   0xb   :  { %502 = vmatpush3.msra.mxu0 %v41_v4  ;;  %569 = vmatpush3.msra.mxu1 %v41_v4  ;;  %v28_v29 = vld [vmem:[%s961_s0 + $0x70] sm:$0xff]  ;;  %v29_v31 = vld [vmem:[%s961_s0 + $0x78] sm:$0xff]  ;;  %v460_v32 = vld [vmem:[%s962_s2] ss:$0 sm:$0xff] }
   0xc   :  { %503 = vmatprep.subr.mxu0 %v40_v5  ;;  %554 = vmatprep.subr.mxu1 %v40_v5 }
   0xd   :  { %504 = vmatpush3.msra.mxu0 %v40_v5  ;;  %570 = vmatpush3.msra.mxu1 %v40_v5 }
   0xe   :  { %505 = vmatprep.subr.mxu0 %v39_v6  ;;  %555 = vmatprep.subr.mxu1 %v39_v6 }
   0xf   :  { %506 = vmatpush3.msra.mxu0 %v39_v6  ;;  %571 = vmatpush3.msra.mxu1 %v39_v6 }
  0x10   :  { %507 = vmatprep.subr.mxu0 %v38_v7  ;;  %556 = vmatprep.subr.mxu1 %v38_v7 }
  0x11   :  { %508 = vmatpush3.msra.mxu0 %v38_v7  ;;  %572 = vmatpush3.msra.mxu1 %v38_v7 }
  0x12   :  { %509 = vmatprep.subr.mxu0 %v37_v8  ;;  %557 = vmatprep.subr.mxu1 %v37_v8 }
  0x13   :  { %510 = vmatpush3.msra.mxu0 %v37_v8  ;;  %573 = vmatpush3.msra.mxu1 %v37_v8 }
  0x14   :  { %511 = vmatprep.subr.mxu0 %v36_v9  ;;  %558 = vmatprep.subr.mxu1 %v36_v9 }
  0x15   :  { %512 = vmatpush3.msra.mxu0 %v36_v9  ;;  %574 = vmatpush3.msra.mxu1 %v36_v9 }
  0x16   :  { %513 = vmatprep.subr.mxu0 %v35_v10  ;;  %559 = vmatprep.subr.mxu1 %v35_v10 }
  0x17   :  { %514 = vmatpush3.msra.mxu0 %v35_v10  ;;  %575 = vmatpush3.msra.mxu1 %v35_v10 }
  0x18   :  { %515 = vmatprep.subr.mxu0 %v34_v11  ;;  %560 = vmatprep.subr.mxu1 %v34_v11 }
  0x19   :  { %516 = vmatpush3.msra.mxu0 %v34_v11  ;;  %576 = vmatpush3.msra.mxu1 %v34_v11 }
  0x1a   :  { %517 = vmatprep.subr.mxu0 %v33_v12  ;;  %561 = vmatprep.subr.mxu1 %v33_v12 }
  0x1b   :  { %518 = vmatpush3.msra.mxu0 %v33_v12  ;;  %577 = vmatpush3.msra.mxu1 %v33_v12 }
  0x1c   :  { %519 = vmatprep.subr.mxu0 %v32_v13  ;;  %562 = vmatprep.subr.mxu1 %v32_v13 }
  0x1d   :  { %520 = vmatpush3.msra.mxu0 %v32_v13  ;;  %578 = vmatpush3.msra.mxu1 %v32_v13 }
  0x1e   :  { %521 = vmatprep.subr.mxu0 %v31_v14  ;;  %563 = vmatprep.subr.mxu1 %v31_v14 }
  0x1f   :  { %522 = vmatpush3.msra.mxu0 %v31_v14  ;;  %579 = vmatpush3.msra.mxu1 %v31_v14 }
  0x20   :  { %523 = vmatprep.subr.mxu0 %v30_v15  ;;  %564 = vmatprep.subr.mxu1 %v30_v15 }
  0x21   :  { %524 = vmatpush3.msra.mxu0 %v30_v15  ;;  %580 = vmatpush3.msra.mxu1 %v30_v15 }
  0x22   :  { %525 = vmatprep.mubr.f32.mxu0 %v14_v16  ;;  %537 = vmatprep.mubr.f32.mxu1 %v22_v17 }
  0x23   :  { %526 = vmatmul.mubr.f32.vlgmr.msra.gmra.mxu0 %v15_v18  ;;  %538 = vmatmul.mubr.f32.vlgmr.msra.gmra.mxu1 %v23_v19 }
  0x24   :  { %528 = vmatprep.mubr.f32.mxu0 %v16_v20  ;;  %540 = vmatprep.mubr.f32.mxu1 %v24_v21 }
  0x27   :  { %529 = vmatmul.mubr.f32.gmra.mxu0 %v17_v22  ;;  %541 = vmatmul.mubr.f32.gmra.mxu1 %v25_v23 }
  0x28   :  { %531 = vmatprep.mubr.f32.mxu0 %v18_v24  ;;  %543 = vmatprep.mubr.f32.mxu1 %v26_v25 }
  0x2b   :  { %532 = vmatmul.mubr.f32.gmra.mxu0 %v19_v26  ;;  %544 = vmatmul.mubr.f32.gmra.mxu1 %v27_v27 }
  0x2c   :  { %534 = vmatprep.mubr.f32.mxu0 %v20_v28  ;;  %546 = vmatprep.mubr.f32.mxu1 %v28_v29 }
  0x2f   :  { %535 = vmatmul.mubr.f32.gmra.mxu0 %v21_v30  ;;  %547 = vmatmul.mubr.f32.gmra.mxu1 %v29_v31 }
  0xe3   :  { %v527_v33 = vpop.f32.mrf.mxu0  ;;  %v539_v34 = vpop.f32.mrf.mxu1 }
  0xe4   :  { %v732_v35 = vadd.f32 %v527_v33, %v460_v32  ;;  %v734_v36 = vadd.f32 %v539_v34, %v460_v32 }
  0xe5   :  { %v119_v37 = vpop.f32.mrf.mxu0  ;;  %v159_v38 = vpop.f32.mrf.mxu1 }
  0xe6   :  { %v199_v39 = vmax.f32 %v732_v35, 0.0  ;;  %v207_v40 = vmax.f32 %v734_v36, 0.0  ;;  %v738_v41 = vadd.f32 %v460_v32, %v119_v37  ;;  %v747_v48 = vadd.f32 %v460_v32, %v159_v38 }
  0xe7   :  { %v530_v42 = vpop.f32.mrf.mxu0  ;;  %v542_v43 = vpop.f32.mrf.mxu1 }
  0xe8   :  { %v740_v44 = vadd.f32 %v530_v42, %v460_v32  ;;  %232 = vadd.xlane.f32.xlu1 %v207_v40  ;;  %216 = vadd.xlane.f32.xlu0 %v199_v39  ;;  %v744_v45 = vadd.f32 %v542_v43, %v460_v32  ;;  %v198_v47 = vmax.f32 %v738_v41, 0.0  ;;  %v206_v55 = vmax.f32 %v747_v48, 0.0 }
  0xe9   :  { %v129_v46 = vpop.f32.mrf.mxu0  ;;  %v169_v50 = vpop.f32.mrf.mxu1 }
  0xea   :  { %v201_v49 = vmax.f32 %v740_v44, 0.0  ;;  %v209_v52 = vmax.f32 %v744_v45, 0.0  ;;  %v752_v56 = vadd.f32 %v460_v32, %v129_v46  ;;  %v754_v57 = vadd.f32 %v460_v32, %v169_v50 }
  0xeb   :  { %v533_v51 = vpop.f32.mrf.mxu0  ;;  %v545_v54 = vpop.f32.mrf.mxu1 }
  0xec   :  { %220 = vadd.xlane.f32.xlu1 %v201_v49  ;;  %214 = vadd.xlane.f32.xlu0 %v198_v47  ;;  %v758_v58 = vadd.f32 %v533_v51, %v460_v32  ;;  %v200_v62 = vmax.f32 %v752_v56, 0.0  ;;  %v208_v63 = vmax.f32 %v754_v57, 0.0  ;;  %v766_v2 = vadd.f32 %v545_v54, %v460_v32 }
  0xed   :  { %v139_v53 = vpop.f32.mrf.mxu0  ;;  %v179_v60 = vpop.f32.mrf.mxu1 }
  0xee   :  { %v760_v59 = vadd.f32 %v460_v32, %v139_v53  ;;  %v203_v0 = vmax.f32 %v758_v58, 0.0  ;;  %v768_v3 = vadd.f32 %v460_v32, %v179_v60  ;;  %v211_v6 = vmax.f32 %v766_v2, 0.0 }
  0xef   :  { %v536_v61 = vpop.f32.mrf.mxu0  ;;  %v548_v5 = vpop.f32.mrf.mxu1 }
  0xf0   :  { %236 = vadd.xlane.f32.xlu1 %v209_v52  ;;  %230 = vadd.xlane.f32.xlu0 %v206_v55  ;;  %v202_v1 = vmax.f32 %v760_v59, 0.0  ;;  %v210_v7 = vmax.f32 %v768_v3, 0.0  ;;  %v776_v8 = vadd.f32 %v536_v61, %v460_v32  ;;  %v786_v13 = vadd.f32 %v548_v5, %v460_v32 }
  0xf1   :  { %v149_v4 = vpop.f32.mrf.mxu0  ;;  %v189_v10 = vpop.f32.mrf.mxu1 }
  0xf2   :  { %v778_v9 = vadd.f32 %v460_v32, %v149_v4  ;;  %v205_v11 = vmax.f32 %v776_v8, 0.0  ;;  %v788_v14 = vadd.f32 %v460_v32, %v189_v10  ;;  %v213_v15 = vmax.f32 %v786_v13, 0.0 }
  0xf4   :  { %218 = vadd.xlane.f32.xlu1 %v200_v62  ;;  %234 = vadd.xlane.f32.xlu0 %v208_v63  ;;  %v204_v12 = vmax.f32 %v778_v9, 0.0  ;;  %v212_v16 = vmax.f32 %v788_v14, 0.0 }
  0xf8   :  { %224 = vadd.xlane.f32.xlu1 %v203_v0  ;;  %222 = vadd.xlane.f32.xlu0 %v202_v1 }
  0xfc   :  { %240 = vadd.xlane.f32.xlu1 %v211_v6  ;;  %238 = vadd.xlane.f32.xlu0 %v210_v7 }
 0x100   :  { %228 = vadd.xlane.f32.xlu1 %v205_v11  ;;  %226 = vadd.xlane.f32.xlu0 %v204_v12 }
 0x104   :  { %244 = vadd.xlane.f32.xlu1 %v213_v15  ;;  %242 = vadd.xlane.f32.xlu0 %v212_v16 }
 0x171   :  { %v233_v17 = vpop.xlane.xlu1 %232  ;;  %v217_v18 = vpop.xlane.xlu0 %216 }
 0x172   :  { %v256_v19 = vmul.f32 0.0078125, %v233_v17  ;;  %v248_v20 = vmul.f32 0.0078125, %v217_v18 }
 0x174   :  { %v800_v21 = vsub.f32 %v199_v39, %v248_v20  ;;  %v804_v24 = vsub.f32 %v207_v40, %v256_v19 }
 0x175   :  { %v221_v22 = vpop.xlane.xlu1 %220  ;;  %v215_v23 = vpop.xlane.xlu0 %214 }
 0x176   :  { %v250_v25 = vmul.f32 0.0078125, %v221_v22  ;;  %v247_v26 = vmul.f32 0.0078125, %v215_v23  ;;  %v280_v27 = vmul.f32 %v800_v21, %v800_v21  ;;  %v288_v34 = vmul.f32 %v804_v24, %v804_v24 }
 0x178   :  { %v808_v28 = vsub.f32 %v198_v47, %v247_v26  ;;  %297 = vadd.xlane.f32.xlu1 %v280_v27  ;;  %v810_v29 = vsub.f32 %v201_v49, %v250_v25 }
 0x179   :  { %v237_v30 = vpop.xlane.xlu1 %236  ;;  %v231_v31 = vpop.xlane.xlu0 %230 }
 0x17a   :  { %v258_v32 = vmul.f32 0.0078125, %v237_v30  ;;  %v255_v33 = vmul.f32 0.0078125, %v231_v31  ;;  %v279_v35 = vmul.f32 %v808_v28, %v808_v28  ;;  %v282_v39 = vmul.f32 %v810_v29, %v810_v29 }
 0x17c   :  { %v816_v36 = vsub.f32 %v206_v55, %v255_v33  ;;  %313 = vadd.xlane.f32.xlu1 %v288_v34  ;;  %295 = vadd.xlane.f32.xlu0 %v279_v35  ;;  %v822_v40 = vsub.f32 %v209_v52, %v258_v32 }
 0x17d   :  { %v219_v37 = vpop.xlane.xlu1 %218  ;;  %v235_v38 = vpop.xlane.xlu0 %234 }
 0x17e   :  { %v249_v41 = vmul.f32 0.0078125, %v219_v37  ;;  %v257_v42 = vmul.f32 0.0078125, %v235_v38  ;;  %v287_v43 = vmul.f32 %v816_v36, %v816_v36  ;;  %v290_v45 = vmul.f32 %v822_v40, %v822_v40 }
 0x180   :  { %v826_v44 = vsub.f32 %v200_v62, %v249_v41  ;;  %301 = vadd.xlane.f32.xlu1 %v282_v39  ;;  %311 = vadd.xlane.f32.xlu0 %v287_v43  ;;  %v828_v46 = vsub.f32 %v208_v63, %v257_v42 }
 0x181   :  { %v225_v47 = vpop.xlane.xlu1 %224  ;;  %v223_v48 = vpop.xlane.xlu0 %222 }
 0x182   :  { %v252_v49 = vmul.f32 0.0078125, %v225_v47  ;;  %v251_v50 = vmul.f32 0.0078125, %v223_v48  ;;  %v281_v51 = vmul.f32 %v826_v44, %v826_v44  ;;  %v289_v55 = vmul.f32 %v828_v46, %v828_v46 }
 0x184   :  { %v836_v52 = vsub.f32 %v203_v0, %v252_v49  ;;  %317 = vadd.xlane.f32.xlu1 %v290_v45  ;;  %299 = vadd.xlane.f32.xlu0 %v281_v51  ;;  %v842_v56 = vsub.f32 %v202_v1, %v251_v50 }
 0x185   :  { %v241_v53 = vpop.xlane.xlu1 %240  ;;  %v239_v54 = vpop.xlane.xlu0 %238 }
 0x186   :  { %v260_v57 = vmul.f32 0.0078125, %v241_v53  ;;  %v259_v60 = vmul.f32 0.0078125, %v239_v54  ;;  %v284_v61 = vmul.f32 %v836_v52, %v836_v52  ;;  %v283_v5 = vmul.f32 %v842_v56, %v842_v56 }
 0x188   :  { %v848_v58 = vsub.f32 %v211_v6, %v260_v57  ;;  %305 = vadd.xlane.f32.xlu1 %v284_v61  ;;  %315 = vadd.xlane.f32.xlu0 %v289_v55  ;;  %v852_v62 = vsub.f32 %v210_v7, %v259_v60 }
 0x189   :  { %v229_v63 = vpop.xlane.xlu1 %228  ;;  %v227_v0 = vpop.xlane.xlu0 %226 }
 0x18a   :  { %v254_v59 = vmul.f32 0.0078125, %v229_v63  ;;  %v253_v1 = vmul.f32 0.0078125, %v227_v0  ;;  %v292_v4 = vmul.f32 %v848_v58, %v848_v58  ;;  %v291_v7 = vmul.f32 %v852_v62, %v852_v62 }
 0x18c   :  { %v860_v2 = vsub.f32 %v205_v11, %v254_v59  ;;  %321 = vadd.xlane.f32.xlu1 %v292_v4  ;;  %303 = vadd.xlane.f32.xlu0 %v283_v5  ;;  %v866_v10 = vsub.f32 %v204_v12, %v253_v1 }
 0x18d   :  { %v245_v6 = vpop.xlane.xlu1 %244  ;;  %v243_v3 = vpop.xlane.xlu0 %242 }
 0x18e   :  { %v262_v17 = vmul.f32 0.0078125, %v245_v6  ;;  %v261_v18 = vmul.f32 0.0078125, %v243_v3  ;;  %v286_v19 = vmul.f32 %v860_v2, %v860_v2  ;;  %v285_v12 = vmul.f32 %v866_v10, %v866_v10 }
 0x190   :  { %v872_v8 = vsub.f32 %v213_v15, %v262_v17  ;;  %309 = vadd.xlane.f32.xlu1 %v286_v19  ;;  %319 = vadd.xlane.f32.xlu0 %v291_v7  ;;  %v876_v11 = vsub.f32 %v212_v16, %v261_v18 }
 0x192   :  { %v294_v9 = vmul.f32 %v872_v8, %v872_v8  ;;  %v293_v20 = vmul.f32 %v876_v11, %v876_v11 }
 0x194   :  { %325 = vadd.xlane.f32.xlu1 %v294_v9  ;;  %307 = vadd.xlane.f32.xlu0 %v285_v12 }
 0x198   :  { %323 = vadd.xlane.f32.xlu0 %v293_v20 }
 0x201   :  { %v298_v13 = vpop.xlane.xlu1 %297 }
 0x202   :  { %v329_v15 = vmul.f32 0.007874016, %v298_v13 }
 0x204   :  { %581 = vrsqrt.f32 %v329_v15  ;;  %vm377_vm0 = vcmp.gt.f32.partialorder %v329_v15, 0.0 }
 0x205   :  { %v314_v22 = vpop.xlane.xlu1 %313  ;;  %v296_v23 = vpop.xlane.xlu0 %295 }
 0x206   :  { %v337_v14 = vmul.f32 0.007874016, %v314_v22  ;;  %v328_v16 = vmul.f32 0.007874016, %v296_v23 }
 0x208   :  { %583 = vrsqrt.f32 %v337_v14  ;;  %vm385_vm1 = vcmp.gt.f32.partialorder %v337_v14, 0.0  ;;  %vm376_vm2 = vcmp.gt.f32.partialorder %v328_v16, 0.0 }
 0x209   :  { %585 = vrsqrt.f32 %v328_v16  ;;  %v302_v25 = vpop.xlane.xlu1 %301  ;;  %v312_v26 = vpop.xlane.xlu0 %311 }
 0x20a   :  { %v331_v27 = vmul.f32 0.007874016, %v302_v25  ;;  %v336_v30 = vmul.f32 0.007874016, %v312_v26 }
 0x20c   :  { %587 = vrsqrt.f32 %v331_v27  ;;  %vm379_vm3 = vcmp.gt.f32.partialorder %v331_v27, 0.0  ;;  %vm384_vm4 = vcmp.gt.f32.partialorder %v336_v30, 0.0 }
 0x20d   :  { %589 = vrsqrt.f32 %v336_v30  ;;  %v318_v31 = vpop.xlane.xlu1 %317  ;;  %v300_v32 = vpop.xlane.xlu0 %299 }
 0x20e   :  { %v339_v33 = vmul.f32 0.007874016, %v318_v31  ;;  %v330_v34 = vmul.f32 0.007874016, %v300_v32 }
 0x210   :  { %591 = vrsqrt.f32 %v339_v33  ;;  %vm387_vm5 = vcmp.gt.f32.partialorder %v339_v33, 0.0  ;;  %vm378_vm6 = vcmp.gt.f32.partialorder %v330_v34, 0.0 }
 0x211   :  { %v582_v35 = vpop.eup %581  ;;  %593 = vrsqrt.f32 %v330_v34  ;;  %v306_v37 = vpop.xlane.xlu1 %305 }
 0x212   :  { %v316_v38 = vpop.xlane.xlu0 %315  ;;  %v361_v39 = vmul.f32 %v582_v35, %v800_v21  ;;  %v885_v41 = vmul.f32 0.007874016, %v306_v37 }
 0x213   :  { %v887_v42 = vmul.f32 0.007874016, %v316_v38 }
 0x214   :  { %v425_v43 = vsel %vm377_vm0, %v361_v39, 0.0  ;;  %595 = vrsqrt.f32 %v885_v41  ;;  %vm381_vm7 = vcmp.gt.f32.partialorder %v885_v41, 0.0 }
 0x215   :  { %v584_v47 = vpop.eup %583  ;;  %441 = vst [vmem:[%s963_s3 + $0x8] sm:$0xff] %v425_v43  ;;  %597 = vrsqrt.f32 %v887_v42  ;;  %v322_v48 = vpop.xlane.xlu1 %321  ;;  %vm386_vm8 = vcmp.gt.f32.partialorder %v887_v42, 0.0 }
 0x216   :  { %v304_v49 = vpop.xlane.xlu0 %303  ;;  %v586_v50 = vpop.eup %585  ;;  %v369_v21 = vmul.f32 %v584_v47, %v804_v24  ;;  %v341_v45 = vmul.f32 0.007874016, %v322_v48 }
 0x217   :  { %v895_v51 = vmul.f32 0.007874016, %v304_v49  ;;  %v360_v53 = vmul.f32 %v586_v50, %v808_v28 }
 0x218   :  { %v433_v54 = vsel %vm385_vm1, %v369_v21, 0.0  ;;  %599 = vrsqrt.f32 %v341_v45  ;;  %vm389_vm9 = vcmp.gt.f32.partialorder %v341_v45, 0.0 }
 0x219   :  { %v588_v55 = vpop.eup %587  ;;  %449 = vst [vmem:[%s963_s3 + $0x48] sm:$0xff] %v433_v54  ;;  %v424_v57 = vsel %vm376_vm2, %v360_v53, 0.0  ;;  %601 = vrsqrt.f32 %v895_v51  ;;  %v310_v60 = vpop.xlane.xlu1 %309  ;;  %vm380_vm10 = vcmp.gt.f32.partialorder %v895_v51, 0.0 }
 0x21a   :  { %v320_v61 = vpop.xlane.xlu0 %319  ;;  %v590_v24 = vpop.eup %589  ;;  %440 = vst [vmem:[%s963_s3] sm:$0xff] %v424_v57  ;;  %v363_v28 = vmul.f32 %v588_v55, %v810_v29  ;;  %v335_v63 = vmul.f32 0.007874016, %v310_v60 }
 0x21b   :  { %v340_v0 = vmul.f32 0.007874016, %v320_v61  ;;  %v368_v59 = vmul.f32 %v590_v24, %v816_v36 }
 0x21c   :  { %v427_v1 = vsel %vm379_vm3, %v363_v28, 0.0  ;;  %603 = vrsqrt.f32 %v335_v63  ;;  %vm383_vm11 = vcmp.gt.f32.partialorder %v335_v63, 0.0 }
 0x21d   :  { %v592_v4 = vpop.eup %591  ;;  %443 = vst [vmem:[%s963_s3 + $0x18] sm:$0xff] %v427_v1  ;;  %v432_v5 = vsel %vm384_vm4, %v368_v59, 0.0  ;;  %605 = vrsqrt.f32 %v340_v0  ;;  %v326_v6 = vpop.xlane.xlu1 %325  ;;  %vm388_vm12 = vcmp.gt.f32.partialorder %v340_v0, 0.0 }
 0x21e   :  { %v308_v3 = vpop.xlane.xlu0 %307  ;;  %v594_v7 = vpop.eup %593  ;;  %448 = vst [vmem:[%s963_s3 + $0x40] sm:$0xff] %v432_v5  ;;  %v371_v29 = vmul.f32 %v592_v4, %v822_v40  ;;  %v343_v36 = vmul.f32 0.007874016, %v326_v6 }
 0x21f   :  { %v334_v17 = vmul.f32 0.007874016, %v308_v3  ;;  %v362_v18 = vmul.f32 %v594_v7, %v826_v44 }
 0x220   :  { %v435_v19 = vsel %vm387_vm5, %v371_v29, 0.0  ;;  %607 = vrsqrt.f32 %v343_v36  ;;  %vm391_vm13 = vcmp.gt.f32.partialorder %v343_v36, 0.0 }
 0x221   :  { %v596_v9 = vpop.eup %595  ;;  %451 = vst [vmem:[%s963_s3 + $0x58] sm:$0xff] %v435_v19  ;;  %v426_v12 = vsel %vm378_vm6, %v362_v18, 0.0  ;;  %609 = vrsqrt.f32 %v334_v17  ;;  %vm382_vm14 = vcmp.gt.f32.partialorder %v334_v17, 0.0 }
 0x222   :  { %v324_v20 = vpop.xlane.xlu0 %323  ;;  %v598_v13 = vpop.eup %597  ;;  %442 = vst [vmem:[%s963_s3 + $0x10] sm:$0xff] %v426_v12  ;;  %v365_v40 = vmul.f32 %v596_v9, %v836_v52 }
 0x223   :  { %v342_v15 = vmul.f32 0.007874016, %v324_v20  ;;  %v370_v44 = vmul.f32 %v598_v13, %v828_v46 }
 0x224   :  { %v429_v22 = vsel %vm381_vm7, %v365_v40, 0.0 }
 0x225   :  { %611 = vrsqrt.f32 %v342_v15  ;;  %v600_v23 = vpop.eup %599  ;;  %445 = vst [vmem:[%s963_s3 + $0x28] sm:$0xff] %v429_v22  ;;  %v434_v14 = vsel %vm386_vm8, %v370_v44, 0.0  ;;  %vm390_vm15 = vcmp.gt.f32.partialorder %v342_v15, 0.0 }
 0x226   :  { %v602_v16 = vpop.eup %601  ;;  %450 = vst [vmem:[%s963_s3 + $0x50] sm:$0xff] %v434_v14  ;;  %v373_v52 = vmul.f32 %v600_v23, %v848_v58 }
 0x227   :  { %v364_v46 = vmul.f32 %v602_v16, %v842_v56 }
 0x228   :  { %v437_v25 = vsel %vm389_vm9, %v373_v52, 0.0 }
 0x229   :  { %v604_v26 = vpop.eup %603  ;;  %453 = vst [vmem:[%s963_s3 + $0x68] sm:$0xff] %v437_v25  ;;  %v428_v27 = vsel %vm380_vm10, %v364_v46, 0.0 }
 0x22a   :  { %v606_v30 = vpop.eup %605  ;;  %444 = vst [vmem:[%s963_s3 + $0x20] sm:$0xff] %v428_v27  ;;  %v367_v31 = vmul.f32 %v604_v26, %v860_v2 }
 0x22b   :  { %v372_v58 = vmul.f32 %v606_v30, %v852_v62 }
 0x22c   :  { %v431_v56 = vsel %vm383_vm11, %v367_v31, 0.0 }
 0x22d   :  { %v608_v32 = vpop.eup %607  ;;  %447 = vst [vmem:[%s963_s3 + $0x38] sm:$0xff] %v431_v56  ;;  %v436_v33 = vsel %vm388_vm12, %v372_v58, 0.0 }
 0x22e   :  { %v610_v34 = vpop.eup %609  ;;  %452 = vst [vmem:[%s963_s3 + $0x60] sm:$0xff] %v436_v33  ;;  %v375_v35 = vmul.f32 %v608_v32, %v872_v8 }
 0x22f   :  { %v366_v2 = vmul.f32 %v610_v34, %v866_v10 }
 0x230   :  { %v439_v37 = vsel %vm391_vm13, %v375_v35, 0.0 }
 0x231   :  { %455 = vst [vmem:[%s963_s3 + $0x78] sm:$0xff] %v439_v37  ;;  %v430_v38 = vsel %vm382_vm14, %v366_v2, 0.0 }
 0x232   :  { %v612_v62 = vpop.eup %611  ;;  %446 = vst [vmem:[%s963_s3 + $0x30] sm:$0xff] %v430_v38 }
 0x233   :  { %v374_v39 = vmul.f32 %v612_v62, %v876_v11 }
 0x235   :  { %v438_v41 = vsel %vm390_vm15, %v374_v39, 0.0 }
 0x236   :  { %454 = vst [vmem:[%s963_s3 + $0x70] sm:$0xff] %v438_v41 }

// kernel: pshgcn_forward.8
= control target key start
LH: loop header
LB: loop body
LE: loop exit
PB: predicated region body
PF: predicated region fallthrough
CT: control target
= control target key end

     0   :  { %9 = vsyncpa [#allocation4], 0  ;;  %s1643_s15 = smov 0   ;;  %s1645_s16 = smov 0   ;;  %s2174_s0 = inlined_call_operand.vmem [shape: f32[2], index: 0, kind: input, shape index: {}]   ;;  %s2175_s1 = inlined_call_operand.vmem [shape: bf16[2,256,256], index: 1, kind: input, shape index: {}]   ;;  %s2176_s2 = inlined_call_operand.vmem [shape: bf16[2,256,128], index: 2, kind: input, shape index: {}]   ;;  %s2177_s3 = inlined_call_operand.vmem [shape: f32[256,128], index: 3, kind: input, shape index: {}, may-alias: {3,4}]   ;;  %s2178_s4 = inlined_call_operand.vmem [shape: f32[256,128], index: 4, kind: output, shape index: {}, may-alias: {3,4}]  }
   0x1   :  { %s1647_s17 = smov 0  }
   0x2 LB: > { %s1280_s18 = sadd.s32 4294967295, %s1615_s17   ;;  %s30_s19 = sadd.s32 1, %s1611_s16  ;;  %s1615_s17 = sphi %s1647_s17, %s15_s17   ;;  %s1611_s16 = sphi %s1645_s16, %s2182_s16   ;;  %s1607_s15 = sphi %s1643_s15, %s2181_s15  }
   0x3   : > { %p32_p0 = scmp.ge.s32.totalorder %s30_s19, 2  ;;  %p1281_p1 = scmp.ge.s32.totalorder %s1615_s17, 1 }
   0x4   : > { %p168_p2 = scmp.lt.s32.totalorder %s1615_s17, 3  ;;  %p1668_p4 = scmp.eq.s32.totalorder %s1280_s18, 0 }
   0x5   : > { %s2184_s19 = smov (%p32_p0, %s30_s19), 0  ;;  %s181_s24 = sshll.u32 %s2174_s0, 4  ;;  %s182_s24 = int_to_ptr.vmem [resolvable:$true] %s181_s24 }
   0x6   : > { %p1664_p3 = pnand %p1281_p1, %p168_p2  ;;  %s1574_s25 = scalar_lea.vmem %s182_s24, 16 }
   0x7   : > { %p1575_p7 = scmp.ne.s32.totalorder %s182_s24, %s1574_s25  ;;  %p1582_p11 = scmp.lt.s32.totalorder %s182_s24, %s182_s24 }
   0x8   : > { %p1479_p5 = pneg %p1664_p3  ;;  %p1583_p12 = scmp.lt.s32.totalorder %s1574_s25, %s1574_s25 }
   0xa   : > { %p1480_p6 = pnand %p1668_p4, %p1479_p5  ;;  %p1584_p13 = por %p1583_p12, %p1582_p11 }
   0xc   : > { %p1576_p8 = pneg %p1480_p6 }
   0xe   : > { %p1577_p9 = pnand %p1576_p8, %p1575_p7 }
  0x10   : > { %p1578_p10 = pneg %p1577_p9 }
  0x12   : > { %p1585_p0 = pnand %p1584_p13, %p1578_p10 }
  0x14   : > { %1588 = shalt.err (!%p1585_p0)
}
  0x15   : > { %s1617_s26 = smov [#allocation3]   ;;  %230 = sbr.rel (%p1664_p3) target bundleno = 417 (0x1a1), region = 36 }
  0x16   : > { %1482 = dma.vmem_to_smem (!%p1480_p6), %s182_s24, 16, %s1617_s26, [#allocation4]  }
  0x1a   : > { %1602 = dma.done.wait (%p1668_p4), [#allocation4], 16  }
  0x1b   : > { %1604 = vsyncadd (%p1668_p4), [#allocation4], 4294967280 }
  0x1c   : > { %236 = sfence }
  0x1d   : > { %p278_p1 = scmp.lt.s32.totalorder %s1607_s15, 1  ;;  %p310_p2 = scmp.eq.s32.totalorder %s1607_s15, 0 }
  0x1e   : > { %v316_v0 = vld [vmem:[%s2177_s3] sm:$0xff] (%p310_p2)  ;;  %v317_v1 = vld [vmem:[%s2177_s3 + $0x8] sm:$0xff] (%p310_p2)  ;;  %v318_v2 = vld [vmem:[%s2177_s3 + $0x10] sm:$0xff] (%p310_p2) }
  0x1f   : > { %s279_s27 = scalar_select %p278_p1, %s1607_s15, 1  ;;  %348 = vst [vmem:[%s2178_s4] sm:$0xff] (%p310_p2), %v316_v0  ;;  %349 = vst [vmem:[%s2178_s4 + $0x8] sm:$0xff] (%p310_p2), %v317_v1 }
  0x20   : > { %315 = sbr.rel (!%p310_p2) target bundleno = 122 (0x7a), region = 44  ;;  %350 = vst [vmem:[%s2178_s4 + $0x10] sm:$0xff] (%p310_p2), %v318_v2 }
  0x21   : > { %s1344_s28 = sshll.u32 %s279_s27, 8  ;;  %s1345_s29 = sshll.u32 %s279_s27, 7 }
  0x22   : > { %s1691_s6 = scalar_lea.vmem %s2175_s1, %s1344_s28  ;;  %s1696_s9 = scalar_lea.vmem %s2176_s2, %s1345_s29 }
  0x27   : > { %v319_v3 = vld [vmem:[%s2177_s3 + $0x18] sm:$0xff]  ;;  %v320_v4 = vld [vmem:[%s2177_s3 + $0x20] sm:$0xff]  ;;  %v321_v5 = vld [vmem:[%s2177_s3 + $0x28] sm:$0xff] }
  0x28   : > { %351 = vst [vmem:[%s2178_s4 + $0x18] sm:$0xff] %v319_v3  ;;  %352 = vst [vmem:[%s2178_s4 + $0x20] sm:$0xff] %v320_v4 }
  0x29   : > { %353 = vst [vmem:[%s2178_s4 + $0x28] sm:$0xff] %v321_v5 }
  0x30   : > { %v322_v6 = vld [vmem:[%s2177_s3 + $0x30] sm:$0xff]  ;;  %v323_v7 = vld [vmem:[%s2177_s3 + $0x38] sm:$0xff]  ;;  %v324_v8 = vld [vmem:[%s2177_s3 + $0x40] sm:$0xff] }
  0x31   : > { %354 = vst [vmem:[%s2178_s4 + $0x30] sm:$0xff] %v322_v6  ;;  %355 = vst [vmem:[%s2178_s4 + $0x38] sm:$0xff] %v323_v7 }
  0x32   : > { %356 = vst [vmem:[%s2178_s4 + $0x40] sm:$0xff] %v324_v8 }
  0x39   : > { %v325_v9 = vld [vmem:[%s2177_s3 + $0x48] sm:$0xff]  ;;  %v326_v10 = vld [vmem:[%s2177_s3 + $0x50] sm:$0xff]  ;;  %v327_v11 = vld [vmem:[%s2177_s3 + $0x58] sm:$0xff] }
  0x3a   : > { %357 = vst [vmem:[%s2178_s4 + $0x48] sm:$0xff] %v325_v9  ;;  %358 = vst [vmem:[%s2178_s4 + $0x50] sm:$0xff] %v326_v10 }
  0x3b   : > { %359 = vst [vmem:[%s2178_s4 + $0x58] sm:$0xff] %v327_v11 }
  0x42   : > { %v328_v12 = vld [vmem:[%s2177_s3 + $0x60] sm:$0xff]  ;;  %v329_v13 = vld [vmem:[%s2177_s3 + $0x68] sm:$0xff]  ;;  %v330_v14 = vld [vmem:[%s2177_s3 + $0x70] sm:$0xff] }
  0x43   : > { %360 = vst [vmem:[%s2178_s4 + $0x60] sm:$0xff] %v328_v12  ;;  %361 = vst [vmem:[%s2178_s4 + $0x68] sm:$0xff] %v329_v13 }
  0x44   : > { %362 = vst [vmem:[%s2178_s4 + $0x70] sm:$0xff] %v330_v14 }
  0x4b   : > { %v331_v15 = vld [vmem:[%s2177_s3 + $0x78] sm:$0xff]  ;;  %v332_v16 = vld [vmem:[%s2177_s3 + $0x80] sm:$0xff]  ;;  %v333_v17 = vld [vmem:[%s2177_s3 + $0x88] sm:$0xff] }
  0x4c   : > { %363 = vst [vmem:[%s2178_s4 + $0x78] sm:$0xff] %v331_v15  ;;  %364 = vst [vmem:[%s2178_s4 + $0x80] sm:$0xff] %v332_v16 }
  0x4d   : > { %365 = vst [vmem:[%s2178_s4 + $0x88] sm:$0xff] %v333_v17 }
  0x54   : > { %v334_v18 = vld [vmem:[%s2177_s3 + $0x90] sm:$0xff]  ;;  %v335_v19 = vld [vmem:[%s2177_s3 + $0x98] sm:$0xff]  ;;  %v336_v20 = vld [vmem:[%s2177_s3 + $0xa0] sm:$0xff] }
  0x55   : > { %366 = vst [vmem:[%s2178_s4 + $0x90] sm:$0xff] %v334_v18  ;;  %367 = vst [vmem:[%s2178_s4 + $0x98] sm:$0xff] %v335_v19 }
  0x56   : > { %368 = vst [vmem:[%s2178_s4 + $0xa0] sm:$0xff] %v336_v20 }
  0x5d   : > { %v337_v21 = vld [vmem:[%s2177_s3 + $0xa8] sm:$0xff]  ;;  %v338_v22 = vld [vmem:[%s2177_s3 + $0xb0] sm:$0xff]  ;;  %v339_v23 = vld [vmem:[%s2177_s3 + $0xb8] sm:$0xff] }
  0x5e   : > { %369 = vst [vmem:[%s2178_s4 + $0xa8] sm:$0xff] %v337_v21  ;;  %370 = vst [vmem:[%s2178_s4 + $0xb0] sm:$0xff] %v338_v22 }
  0x5f   : > { %371 = vst [vmem:[%s2178_s4 + $0xb8] sm:$0xff] %v339_v23 }
  0x66   : > { %v340_v24 = vld [vmem:[%s2177_s3 + $0xc0] sm:$0xff]  ;;  %v341_v25 = vld [vmem:[%s2177_s3 + $0xc8] sm:$0xff]  ;;  %v342_v26 = vld [vmem:[%s2177_s3 + $0xd0] sm:$0xff] }
  0x67   : > { %372 = vst [vmem:[%s2178_s4 + $0xc0] sm:$0xff] %v340_v24  ;;  %373 = vst [vmem:[%s2178_s4 + $0xc8] sm:$0xff] %v341_v25 }
  0x68   : > { %374 = vst [vmem:[%s2178_s4 + $0xd0] sm:$0xff] %v342_v26 }
  0x6f   : > { %v343_v27 = vld [vmem:[%s2177_s3 + $0xd8] sm:$0xff]  ;;  %v344_v28 = vld [vmem:[%s2177_s3 + $0xe0] sm:$0xff]  ;;  %v345_v29 = vld [vmem:[%s2177_s3 + $0xe8] sm:$0xff] }
  0x70   : > { %375 = vst [vmem:[%s2178_s4 + $0xd8] sm:$0xff] %v343_v27  ;;  %376 = vst [vmem:[%s2178_s4 + $0xe0] sm:$0xff] %v344_v28 }
  0x71   : > { %377 = vst [vmem:[%s2178_s4 + $0xe8] sm:$0xff] %v345_v29 }
  0x78   : > { %v346_v30 = vld [vmem:[%s2177_s3 + $0xf0] sm:$0xff]  ;;  %v347_v31 = vld [vmem:[%s2177_s3 + $0xf8] sm:$0xff] }
  0x79   : > { %378 = vst [vmem:[%s2178_s4 + $0xf0] sm:$0xff] %v346_v30  ;;  %379 = vst [vmem:[%s2178_s4 + $0xf8] sm:$0xff] %v347_v31 }
  0x7a PF: > { %v1510_v32 = vld [vmem:[%s1696_s9 + $0x78] sm:$0xff]   ;;  %v1512_v34 = vld [vmem:[%s1696_s9 + $0x70] sm:$0xff]   ;;  %v1514_v36 = vld [vmem:[%s1696_s9 + $0x68] sm:$0xff]  }
  0x7b   : > { %v1511_v33 = vld [vmem:[%s1696_s9 + $0x38] sm:$0xff]   ;;  %1347 = vmatprep.subr.bf16.mxu0 %v1510_v32  ;;  %1459 = vmatprep.subr.bf16.mxu1 %v1510_v32  ;;  %v1513_v35 = vld [vmem:[%s1696_s9 + $0x30] sm:$0xff]   ;;  %v1515_v37 = vld [vmem:[%s1696_s9 + $0x28] sm:$0xff]  }
  0x7c   : > { %1348 = vmatpush3.bf16.msra.mxu0 %v1511_v33  ;;  %1467 = vmatpush3.bf16.msra.mxu1 %v1511_v33  ;;  %v1516_v38 = vld [vmem:[%s1696_s9 + $0x60] sm:$0xff]   ;;  %v1518_v40 = vld [vmem:[%s1696_s9 + $0x58] sm:$0xff]   ;;  %v1520_v42 = vld [vmem:[%s1696_s9 + $0x50] sm:$0xff]  }
  0x7d   : > { %1349 = vmatprep.subr.bf16.mxu0 %v1512_v34  ;;  %1460 = vmatprep.subr.bf16.mxu1 %v1512_v34  ;;  %v1517_v39 = vld [vmem:[%s1696_s9 + $0x20] sm:$0xff]   ;;  %v1519_v41 = vld [vmem:[%s1696_s9 + $0x18] sm:$0xff]   ;;  %v1521_v45 = vld [vmem:[%s1696_s9 + $0x10] sm:$0xff]  }
  0x7e   : > { %v1528_v43 = vld [vmem:[%s1691_s6 + $0x4] ss:$8 sps:$4 sm:$0xff]   ;;  %v1526_v50 = vld [vmem:[%s1691_s6] ss:$8 sps:$4 sm:$0xff]   ;;  %v1532_v52 = vld [vmem:[%s1691_s6 + $0x14] ss:$8 sps:$4 sm:$0xff]  }
  0x7f   : > { %v1531_v44 = vld [vmem:[%s1691_s6 + $0x84] ss:$8 sps:$4 sm:$0xff]   ;;  %804 = vmatprep.mubr.bf16.mxu0 %v1528_v43  ;;  %v1529_v51 = vld [vmem:[%s1691_s6 + $0x80] ss:$8 sps:$4 sm:$0xff]   ;;  %v1534_v53 = vld [vmem:[%s1691_s6 + $0x94] ss:$8 sps:$4 sm:$0xff]  }
  0x80   : > { %1350 = vmatpush3.bf16.msra.mxu0 %v1513_v35  ;;  %1468 = vmatpush3.bf16.msra.mxu1 %v1513_v35  ;;  %v1522_v46 = vld [vmem:[%s1696_s9 + $0x48] sm:$0xff]   ;;  %v1524_v48 = vld [vmem:[%s1696_s9 + $0x40] sm:$0xff]   ;;  %v1536_v54 = vld [vmem:[%s1691_s6 + $0x10] ss:$8 sps:$4 sm:$0xff]  }
  0x81   : > { %1351 = vmatprep.subr.bf16.mxu0 %v1514_v36  ;;  %1461 = vmatprep.subr.bf16.mxu1 %v1514_v36  ;;  %v1523_v47 = vld [vmem:[%s1696_s9 + $0x8] sm:$0xff]   ;;  %v1525_v49 = vld [vmem:[%s1696_s9] sm:$0xff]   ;;  %v1537_v55 = vld [vmem:[%s1691_s6 + $0x90] ss:$8 sps:$4 sm:$0xff]   ;;  %s1064_s9 = sld [smem:[#allocation3 + %s1607_s15]] }
  0x82   : > { %868 = vmatprep.mubr.bf16.mxu1 %v1531_v44  ;;  %v1538_v56 = vld [vmem:[%s1691_s6 + $0x24] ss:$8 sps:$4 sm:$0xff]   ;;  %v1542_v58 = vld [vmem:[%s1691_s6 + $0x20] ss:$8 sps:$4 sm:$0xff]   ;;  %v1544_v60 = vld [vmem:[%s1691_s6 + $0x34] ss:$8 sps:$4 sm:$0xff]  }
  0x83   : > { %v1540_v57 = vld [vmem:[%s1691_s6 + $0xa4] ss:$8 sps:$4 sm:$0xff]   ;;  %v1543_v59 = vld [vmem:[%s1691_s6 + $0xa0] ss:$8 sps:$4 sm:$0xff]   ;;  %v1546_v61 = vld [vmem:[%s1691_s6 + $0xb4] ss:$8 sps:$4 sm:$0xff]  }
  0x84   : > { %1352 = vmatpush3.bf16.msra.mxu0 %v1515_v37  ;;  %1469 = vmatpush3.bf16.msra.mxu1 %v1515_v37  ;;  %v1548_v62 = vld [vmem:[%s1691_s6 + $0x30] ss:$8 sps:$4 sm:$0xff]   ;;  %v1550_v0 = vld [vmem:[%s1691_s6 + $0x44] ss:$8 sps:$4 sm:$0xff]   ;;  %v1554_v2 = vld [vmem:[%s1691_s6 + $0x40] ss:$8 sps:$4 sm:$0xff]  }
  0x85   : > { %1353 = vmatprep.subr.bf16.mxu0 %v1516_v38  ;;  %1462 = vmatprep.subr.bf16.mxu1 %v1516_v38  ;;  %v1549_v63 = vld [vmem:[%s1691_s6 + $0xb0] ss:$8 sps:$4 sm:$0xff]   ;;  %v1552_v1 = vld [vmem:[%s1691_s6 + $0xc4] ss:$8 sps:$4 sm:$0xff]   ;;  %v1555_v3 = vld [vmem:[%s1691_s6 + $0xc0] ss:$8 sps:$4 sm:$0xff]  }
  0x86   : > { %v1556_v4 = vld [vmem:[%s1691_s6 + $0x54] ss:$8 sps:$4 sm:$0xff]   ;;  %v1560_v6 = vld [vmem:[%s1691_s6 + $0x50] ss:$8 sps:$4 sm:$0xff]   ;;  %v1562_v8 = vld [vmem:[%s1691_s6 + $0x64] ss:$8 sps:$4 sm:$0xff]  }
  0x87   : > { %v1558_v5 = vld [vmem:[%s1691_s6 + $0xd4] ss:$8 sps:$4 sm:$0xff]   ;;  %v1561_v7 = vld [vmem:[%s1691_s6 + $0xd0] ss:$8 sps:$4 sm:$0xff]   ;;  %v1564_v9 = vld [vmem:[%s1691_s6 + $0xe4] ss:$8 sps:$4 sm:$0xff]   ;;  %v1939_v19 = vstv %s1064_s9 }
  0x88   : > { %1354 = vmatpush3.bf16.msra.mxu0 %v1517_v39  ;;  %1470 = vmatpush3.bf16.msra.mxu1 %v1517_v39  ;;  %v1566_v10 = vld [vmem:[%s1691_s6 + $0x60] ss:$8 sps:$4 sm:$0xff]   ;;  %v1568_v12 = vld [vmem:[%s1691_s6 + $0x74] ss:$8 sps:$4 sm:$0xff]   ;;  %v1572_v14 = vld [vmem:[%s1691_s6 + $0x70] ss:$8 sps:$4 sm:$0xff]  }
  0x89   : > { %1355 = vmatprep.subr.bf16.mxu0 %v1518_v40  ;;  %1463 = vmatprep.subr.bf16.mxu1 %v1518_v40  ;;  %v1567_v11 = vld [vmem:[%s1691_s6 + $0xe0] ss:$8 sps:$4 sm:$0xff]   ;;  %v1570_v13 = vld [vmem:[%s1691_s6 + $0xf4] ss:$8 sps:$4 sm:$0xff]   ;;  %v1573_v15 = vld [vmem:[%s1691_s6 + $0xf0] ss:$8 sps:$4 sm:$0xff]  }
  0x8a   : > { %v1032_v23 = vld [vmem:[%s2178_s4] sm:$0xff]  ;;  %v1033_v35 = vld [vmem:[%s2178_s4 + $0x8] sm:$0xff] }
  0x8b   : > { %v1048_v24 = vld [vmem:[%s2178_s4 + $0x80] sm:$0xff]  ;;  %v1049_v36 = vld [vmem:[%s2178_s4 + $0x88] sm:$0xff] }
  0x8c   : > { %1356 = vmatpush3.bf16.msra.mxu0 %v1519_v41  ;;  %1471 = vmatpush3.bf16.msra.mxu1 %v1519_v41 }
  0x8d   : > { %1357 = vmatprep.subr.bf16.mxu0 %v1520_v42  ;;  %1464 = vmatprep.subr.bf16.mxu1 %v1520_v42 }
  0x90   : > { %1358 = vmatpush3.bf16.msra.mxu0 %v1521_v45  ;;  %1472 = vmatpush3.bf16.msra.mxu1 %v1521_v45 }
  0x91   : > { %1359 = vmatprep.subr.bf16.mxu0 %v1522_v46  ;;  %1465 = vmatprep.subr.bf16.mxu1 %v1522_v46 }
  0x94   : > { %1360 = vmatpush3.bf16.msra.mxu0 %v1523_v47  ;;  %1473 = vmatpush3.bf16.msra.mxu1 %v1523_v47  ;;  %v1034_v47 = vld [vmem:[%s2178_s4 + $0x10] sm:$0xff] }
  0x95   : > { %1361 = vmatprep.subr.bf16.mxu0 %v1524_v48  ;;  %1466 = vmatprep.subr.bf16.mxu1 %v1524_v48  ;;  %v1050_v48 = vld [vmem:[%s2178_s4 + $0x90] sm:$0xff] }
  0x98   : > { %1362 = vmatpush3.bf16.msra.mxu0 %v1525_v49  ;;  %1474 = vmatpush3.bf16.msra.mxu1 %v1525_v49 }
  0x9b   : > { %805 = vmatmul.mubr.bf16.vlgmr.msra.gmra.mxu0 %v1526_v50  ;;  %869 = vmatmul.mubr.bf16.vlgmr.msra.gmra.mxu1 %v1529_v51 }
  0x9c   : > { %812 = vmatprep.mubr.bf16.mxu0 %v1532_v52  ;;  %876 = vmatprep.mubr.bf16.mxu1 %v1534_v53 }
  0xa3   : > { %813 = vmatmul.mubr.bf16.gmra.mxu0 %v1536_v54  ;;  %877 = vmatmul.mubr.bf16.gmra.mxu1 %v1537_v55 }
  0xa4   : > { %820 = vmatprep.mubr.bf16.mxu0 %v1538_v56  ;;  %884 = vmatprep.mubr.bf16.mxu1 %v1540_v57 }
  0xab   : > { %821 = vmatmul.mubr.bf16.gmra.mxu0 %v1542_v58  ;;  %885 = vmatmul.mubr.bf16.gmra.mxu1 %v1543_v59  ;;  %v1035_v59 = vld [vmem:[%s2178_s4 + $0x18] sm:$0xff] }
  0xac   : > { %828 = vmatprep.mubr.bf16.mxu0 %v1544_v60  ;;  %892 = vmatprep.mubr.bf16.mxu1 %v1546_v61  ;;  %v1051_v60 = vld [vmem:[%s2178_s4 + $0x98] sm:$0xff] }
  0xb3   : > { %829 = vmatmul.mubr.bf16.gmra.mxu0 %v1548_v62  ;;  %893 = vmatmul.mubr.bf16.gmra.mxu1 %v1549_v63 }
  0xb4   : > { %836 = vmatprep.mubr.bf16.mxu0 %v1550_v0  ;;  %900 = vmatprep.mubr.bf16.mxu1 %v1552_v1 }
  0xbb   : > { %837 = vmatmul.mubr.bf16.gmra.mxu0 %v1554_v2  ;;  %901 = vmatmul.mubr.bf16.gmra.mxu1 %v1555_v3 }
  0xbc   : > { %844 = vmatprep.mubr.bf16.mxu0 %v1556_v4  ;;  %908 = vmatprep.mubr.bf16.mxu1 %v1558_v5 }
  0xc3   : > { %845 = vmatmul.mubr.bf16.gmra.mxu0 %v1560_v6  ;;  %909 = vmatmul.mubr.bf16.gmra.mxu1 %v1561_v7  ;;  %v1036_v7 = vld [vmem:[%s2178_s4 + $0x20] sm:$0xff] }
  0xc4   : > { %852 = vmatprep.mubr.bf16.mxu0 %v1562_v8  ;;  %916 = vmatprep.mubr.bf16.mxu1 %v1564_v9  ;;  %v1052_v8 = vld [vmem:[%s2178_s4 + $0xa0] sm:$0xff] }
  0xcb   : > { %853 = vmatmul.mubr.bf16.gmra.mxu0 %v1566_v10  ;;  %917 = vmatmul.mubr.bf16.gmra.mxu1 %v1567_v11 }
  0xcc   : > { %860 = vmatprep.mubr.bf16.mxu0 %v1568_v12  ;;  %924 = vmatprep.mubr.bf16.mxu1 %v1570_v13 }
  0xd3   : > { %861 = vmatmul.mubr.bf16.gmra.mxu0 %v1572_v14  ;;  %925 = vmatmul.mubr.bf16.gmra.mxu1 %v1573_v15 }
 0x15b   : > { %v1363_v16 = vpop.f32.mrf.mxu0  ;;  %v1411_v17 = vpop.f32.mrf.mxu1 }
 0x15d   : > { %v1364_v18 = vpop.f32.mrf.mxu0  ;;  %v1412_v20 = vpop.f32.mrf.mxu1 }
 0x15e   : > { %v1365_v21 = vadd.f32 %v1364_v18, %v1363_v16  ;;  %v1413_v22 = vadd.f32 %v1412_v20, %v1411_v17  ;;  %v1037_v20 = vld [vmem:[%s2178_s4 + $0x28] sm:$0xff] }
 0x15f   : > { %v1366_v25 = vpop.f32.mrf.mxu0  ;;  %v1414_v26 = vpop.f32.mrf.mxu1 }
 0x160   : > { %v1066_v27 = vmul.f32 %v1365_v21, %v1939_v19  ;;  %v1082_v28 = vmul.f32 %v1413_v22, %v1939_v19  ;;  %v1053_v21 = vld [vmem:[%s2178_s4 + $0xa8] sm:$0xff] }
 0x161   : > { %v1367_v29 = vpop.f32.mrf.mxu0  ;;  %v1415_v30 = vpop.f32.mrf.mxu1 }
 0x162   : > { %v1098_v31 = vadd.f32 %v1066_v27, %v1032_v23  ;;  %v1114_v32 = vadd.f32 %v1082_v28, %v1048_v24  ;;  %v1368_v33 = vadd.f32 %v1367_v29, %v1366_v25  ;;  %v1416_v34 = vadd.f32 %v1415_v30, %v1414_v26 }
 0x163   : > { %v1369_v37 = vpop.f32.mrf.mxu0  ;;  %v1417_v38 = vpop.f32.mrf.mxu1 }
 0x164   : > { %1130 = vst [vmem:[%s2178_s4] sm:$0xff] %v1098_v31  ;;  %1146 = vst [vmem:[%s2178_s4 + $0x80] sm:$0xff] %v1114_v32  ;;  %v1067_v39 = vmul.f32 %v1368_v33, %v1939_v19  ;;  %v1083_v40 = vmul.f32 %v1416_v34, %v1939_v19  ;;  %v1038_v32 = vld [vmem:[%s2178_s4 + $0x30] sm:$0xff] }
 0x165   : > { %v1370_v41 = vpop.f32.mrf.mxu0  ;;  %v1418_v42 = vpop.f32.mrf.mxu1  ;;  %v1054_v33 = vld [vmem:[%s2178_s4 + $0xb0] sm:$0xff] }
 0x166   : > { %v1099_v43 = vadd.f32 %v1067_v39, %v1033_v35  ;;  %v1115_v44 = vadd.f32 %v1083_v40, %v1049_v36  ;;  %v1371_v45 = vadd.f32 %v1370_v41, %v1369_v37  ;;  %v1419_v46 = vadd.f32 %v1418_v42, %v1417_v38 }
 0x167   : > { %v1372_v49 = vpop.f32.mrf.mxu0  ;;  %v1420_v50 = vpop.f32.mrf.mxu1 }
 0x168   : > { %1131 = vst [vmem:[%s2178_s4 + $0x8] sm:$0xff] %v1099_v43  ;;  %1147 = vst [vmem:[%s2178_s4 + $0x88] sm:$0xff] %v1115_v44  ;;  %v1068_v51 = vmul.f32 %v1371_v45, %v1939_v19  ;;  %v1084_v52 = vmul.f32 %v1419_v46, %v1939_v19  ;;  %v1039_v44 = vld [vmem:[%s2178_s4 + $0x38] sm:$0xff] }
 0x169   : > { %v1373_v53 = vpop.f32.mrf.mxu0  ;;  %v1421_v54 = vpop.f32.mrf.mxu1  ;;  %v1055_v45 = vld [vmem:[%s2178_s4 + $0xb8] sm:$0xff] }
 0x16a   : > { %v1100_v55 = vadd.f32 %v1068_v51, %v1034_v47  ;;  %v1116_v56 = vadd.f32 %v1084_v52, %v1050_v48  ;;  %v1374_v57 = vadd.f32 %v1373_v53, %v1372_v49  ;;  %v1422_v58 = vadd.f32 %v1421_v54, %v1420_v50 }
 0x16b   : > { %v1375_v61 = vpop.f32.mrf.mxu0  ;;  %v1423_v62 = vpop.f32.mrf.mxu1 }
 0x16c   : > { %1132 = vst [vmem:[%s2178_s4 + $0x10] sm:$0xff] %v1100_v55  ;;  %1148 = vst [vmem:[%s2178_s4 + $0x90] sm:$0xff] %v1116_v56  ;;  %v1069_v63 = vmul.f32 %v1374_v57, %v1939_v19  ;;  %v1085_v0 = vmul.f32 %v1422_v58, %v1939_v19  ;;  %v1040_v56 = vld [vmem:[%s2178_s4 + $0x40] sm:$0xff] }
 0x16d   : > { %v1376_v1 = vpop.f32.mrf.mxu0  ;;  %v1424_v2 = vpop.f32.mrf.mxu1  ;;  %v1056_v57 = vld [vmem:[%s2178_s4 + $0xc0] sm:$0xff] }
 0x16e   : > { %v1101_v3 = vadd.f32 %v1069_v63, %v1035_v59  ;;  %v1117_v4 = vadd.f32 %v1085_v0, %v1051_v60  ;;  %v1377_v5 = vadd.f32 %v1376_v1, %v1375_v61  ;;  %v1425_v6 = vadd.f32 %v1424_v2, %v1423_v62 }
 0x16f   : > { %v1378_v9 = vpop.f32.mrf.mxu0  ;;  %v1426_v10 = vpop.f32.mrf.mxu1 }
 0x170   : > { %1133 = vst [vmem:[%s2178_s4 + $0x18] sm:$0xff] %v1101_v3  ;;  %1149 = vst [vmem:[%s2178_s4 + $0x98] sm:$0xff] %v1117_v4  ;;  %v1070_v11 = vmul.f32 %v1377_v5, %v1939_v19  ;;  %v1086_v12 = vmul.f32 %v1425_v6, %v1939_v19  ;;  %v1041_v4 = vld [vmem:[%s2178_s4 + $0x48] sm:$0xff] }
 0x171   : > { %v1379_v13 = vpop.f32.mrf.mxu0  ;;  %v1427_v14 = vpop.f32.mrf.mxu1  ;;  %v1057_v5 = vld [vmem:[%s2178_s4 + $0xc8] sm:$0xff] }
 0x172   : > { %v1102_v15 = vadd.f32 %v1070_v11, %v1036_v7  ;;  %v1118_v16 = vadd.f32 %v1086_v12, %v1052_v8  ;;  %v1380_v17 = vadd.f32 %v1379_v13, %v1378_v9  ;;  %v1428_v18 = vadd.f32 %v1427_v14, %v1426_v10 }
 0x173   : > { %v1381_v22 = vpop.f32.mrf.mxu0  ;;  %v1429_v23 = vpop.f32.mrf.mxu1 }
 0x174   : > { %1134 = vst [vmem:[%s2178_s4 + $0x20] sm:$0xff] %v1102_v15  ;;  %1150 = vst [vmem:[%s2178_s4 + $0xa0] sm:$0xff] %v1118_v16  ;;  %v1071_v24 = vmul.f32 %v1380_v17, %v1939_v19  ;;  %v1087_v25 = vmul.f32 %v1428_v18, %v1939_v19  ;;  %v1042_v16 = vld [vmem:[%s2178_s4 + $0x50] sm:$0xff] }
 0x175   : > { %v1382_v26 = vpop.f32.mrf.mxu0  ;;  %v1430_v27 = vpop.f32.mrf.mxu1  ;;  %v1058_v17 = vld [vmem:[%s2178_s4 + $0xd0] sm:$0xff] }
 0x176   : > { %v1103_v28 = vadd.f32 %v1071_v24, %v1037_v20  ;;  %v1119_v29 = vadd.f32 %v1087_v25, %v1053_v21  ;;  %v1383_v30 = vadd.f32 %v1382_v26, %v1381_v22  ;;  %v1431_v31 = vadd.f32 %v1430_v27, %v1429_v23 }
 0x177   : > { %v1384_v34 = vpop.f32.mrf.mxu0  ;;  %v1432_v35 = vpop.f32.mrf.mxu1 }
 0x178   : > { %1135 = vst [vmem:[%s2178_s4 + $0x28] sm:$0xff] %v1103_v28  ;;  %1151 = vst [vmem:[%s2178_s4 + $0xa8] sm:$0xff] %v1119_v29  ;;  %v1072_v36 = vmul.f32 %v1383_v30, %v1939_v19  ;;  %v1088_v37 = vmul.f32 %v1431_v31, %v1939_v19  ;;  %v1043_v29 = vld [vmem:[%s2178_s4 + $0x58] sm:$0xff] }
 0x179   : > { %v1385_v38 = vpop.f32.mrf.mxu0  ;;  %v1433_v39 = vpop.f32.mrf.mxu1  ;;  %v1059_v30 = vld [vmem:[%s2178_s4 + $0xd8] sm:$0xff] }
 0x17a   : > { %v1104_v40 = vadd.f32 %v1072_v36, %v1038_v32  ;;  %v1120_v41 = vadd.f32 %v1088_v37, %v1054_v33  ;;  %v1386_v42 = vadd.f32 %v1385_v38, %v1384_v34  ;;  %v1434_v43 = vadd.f32 %v1433_v39, %v1432_v35 }
 0x17b   : > { %v1387_v46 = vpop.f32.mrf.mxu0  ;;  %v1435_v47 = vpop.f32.mrf.mxu1 }
 0x17c   : > { %1136 = vst [vmem:[%s2178_s4 + $0x30] sm:$0xff] %v1104_v40  ;;  %1152 = vst [vmem:[%s2178_s4 + $0xb0] sm:$0xff] %v1120_v41  ;;  %v1073_v48 = vmul.f32 %v1386_v42, %v1939_v19  ;;  %v1089_v49 = vmul.f32 %v1434_v43, %v1939_v19  ;;  %v1044_v41 = vld [vmem:[%s2178_s4 + $0x60] sm:$0xff] }
 0x17d   : > { %v1388_v50 = vpop.f32.mrf.mxu0  ;;  %v1436_v51 = vpop.f32.mrf.mxu1  ;;  %v1060_v42 = vld [vmem:[%s2178_s4 + $0xe0] sm:$0xff] }
 0x17e   : > { %v1105_v52 = vadd.f32 %v1073_v48, %v1039_v44  ;;  %v1121_v53 = vadd.f32 %v1089_v49, %v1055_v45  ;;  %v1389_v54 = vadd.f32 %v1388_v50, %v1387_v46  ;;  %v1437_v55 = vadd.f32 %v1436_v51, %v1435_v47 }
 0x17f   : > { %v1390_v58 = vpop.f32.mrf.mxu0  ;;  %v1438_v59 = vpop.f32.mrf.mxu1 }
 0x180   : > { %1137 = vst [vmem:[%s2178_s4 + $0x38] sm:$0xff] %v1105_v52  ;;  %1153 = vst [vmem:[%s2178_s4 + $0xb8] sm:$0xff] %v1121_v53  ;;  %v1074_v60 = vmul.f32 %v1389_v54, %v1939_v19  ;;  %v1090_v61 = vmul.f32 %v1437_v55, %v1939_v19  ;;  %v1045_v53 = vld [vmem:[%s2178_s4 + $0x68] sm:$0xff] }
 0x181   : > { %v1391_v62 = vpop.f32.mrf.mxu0  ;;  %v1439_v63 = vpop.f32.mrf.mxu1  ;;  %v1061_v54 = vld [vmem:[%s2178_s4 + $0xe8] sm:$0xff] }
 0x182   : > { %v1106_v0 = vadd.f32 %v1074_v60, %v1040_v56  ;;  %v1122_v1 = vadd.f32 %v1090_v61, %v1056_v57  ;;  %v1392_v2 = vadd.f32 %v1391_v62, %v1390_v58  ;;  %v1440_v3 = vadd.f32 %v1439_v63, %v1438_v59 }
 0x183   : > { %v1393_v6 = vpop.f32.mrf.mxu0  ;;  %v1441_v7 = vpop.f32.mrf.mxu1 }
 0x184   : > { %1138 = vst [vmem:[%s2178_s4 + $0x40] sm:$0xff] %v1106_v0  ;;  %1154 = vst [vmem:[%s2178_s4 + $0xc0] sm:$0xff] %v1122_v1  ;;  %v1075_v8 = vmul.f32 %v1392_v2, %v1939_v19  ;;  %v1091_v9 = vmul.f32 %v1440_v3, %v1939_v19  ;;  %v1046_v1 = vld [vmem:[%s2178_s4 + $0x70] sm:$0xff] }
 0x185   : > { %v1394_v10 = vpop.f32.mrf.mxu0  ;;  %v1442_v11 = vpop.f32.mrf.mxu1  ;;  %v1062_v2 = vld [vmem:[%s2178_s4 + $0xf0] sm:$0xff] }
 0x186   : > { %v1107_v12 = vadd.f32 %v1075_v8, %v1041_v4  ;;  %v1123_v13 = vadd.f32 %v1091_v9, %v1057_v5  ;;  %v1395_v14 = vadd.f32 %v1394_v10, %v1393_v6  ;;  %v1443_v15 = vadd.f32 %v1442_v11, %v1441_v7 }
 0x187   : > { %v1396_v18 = vpop.f32.mrf.mxu0  ;;  %v1444_v20 = vpop.f32.mrf.mxu1 }
 0x188   : > { %1139 = vst [vmem:[%s2178_s4 + $0x48] sm:$0xff] %v1107_v12  ;;  %1155 = vst [vmem:[%s2178_s4 + $0xc8] sm:$0xff] %v1123_v13  ;;  %v1076_v21 = vmul.f32 %v1395_v14, %v1939_v19  ;;  %v1092_v22 = vmul.f32 %v1443_v15, %v1939_v19  ;;  %v1047_v13 = vld [vmem:[%s2178_s4 + $0x78] sm:$0xff] }
 0x189   : > { %v1397_v23 = vpop.f32.mrf.mxu0  ;;  %v1445_v24 = vpop.f32.mrf.mxu1  ;;  %v1063_v14 = vld [vmem:[%s2178_s4 + $0xf8] sm:$0xff] }
 0x18a   : > { %v1108_v25 = vadd.f32 %v1076_v21, %v1042_v16  ;;  %v1124_v26 = vadd.f32 %v1092_v22, %v1058_v17  ;;  %v1398_v27 = vadd.f32 %v1397_v23, %v1396_v18  ;;  %v1446_v28 = vadd.f32 %v1445_v24, %v1444_v20 }
 0x18b   : > { %v1399_v31 = vpop.f32.mrf.mxu0  ;;  %v1447_v32 = vpop.f32.mrf.mxu1 }
 0x18c   : > { %1140 = vst [vmem:[%s2178_s4 + $0x50] sm:$0xff] %v1108_v25  ;;  %1156 = vst [vmem:[%s2178_s4 + $0xd0] sm:$0xff] %v1124_v26  ;;  %v1077_v33 = vmul.f32 %v1398_v27, %v1939_v19  ;;  %v1093_v34 = vmul.f32 %v1446_v28, %v1939_v19 }
 0x18d   : > { %v1400_v35 = vpop.f32.mrf.mxu0  ;;  %v1448_v36 = vpop.f32.mrf.mxu1 }
 0x18e   : > { %v1109_v37 = vadd.f32 %v1077_v33, %v1043_v29  ;;  %v1125_v38 = vadd.f32 %v1093_v34, %v1059_v30  ;;  %v1401_v39 = vadd.f32 %v1400_v35, %v1399_v31  ;;  %v1449_v40 = vadd.f32 %v1448_v36, %v1447_v32 }
 0x18f   : > { %v1402_v43 = vpop.f32.mrf.mxu0  ;;  %v1450_v44 = vpop.f32.mrf.mxu1 }
 0x190   : > { %1141 = vst [vmem:[%s2178_s4 + $0x58] sm:$0xff] %v1109_v37  ;;  %1157 = vst [vmem:[%s2178_s4 + $0xd8] sm:$0xff] %v1125_v38  ;;  %v1078_v45 = vmul.f32 %v1401_v39, %v1939_v19  ;;  %v1094_v46 = vmul.f32 %v1449_v40, %v1939_v19 }
 0x191   : > { %v1403_v47 = vpop.f32.mrf.mxu0  ;;  %v1451_v48 = vpop.f32.mrf.mxu1 }
 0x192   : > { %v1110_v49 = vadd.f32 %v1078_v45, %v1044_v41  ;;  %v1126_v50 = vadd.f32 %v1094_v46, %v1060_v42  ;;  %v1404_v51 = vadd.f32 %v1403_v47, %v1402_v43  ;;  %v1452_v52 = vadd.f32 %v1451_v48, %v1450_v44 }
 0x193   : > { %v1405_v55 = vpop.f32.mrf.mxu0  ;;  %v1453_v56 = vpop.f32.mrf.mxu1 }
 0x194   : > { %1142 = vst [vmem:[%s2178_s4 + $0x60] sm:$0xff] %v1110_v49  ;;  %1158 = vst [vmem:[%s2178_s4 + $0xe0] sm:$0xff] %v1126_v50  ;;  %v1079_v57 = vmul.f32 %v1404_v51, %v1939_v19  ;;  %v1095_v58 = vmul.f32 %v1452_v52, %v1939_v19 }
 0x195   : > { %v1406_v59 = vpop.f32.mrf.mxu0  ;;  %v1454_v60 = vpop.f32.mrf.mxu1 }
 0x196   : > { %v1111_v61 = vadd.f32 %v1079_v57, %v1045_v53  ;;  %v1127_v62 = vadd.f32 %v1095_v58, %v1061_v54  ;;  %v1407_v63 = vadd.f32 %v1406_v59, %v1405_v55  ;;  %v1455_v0 = vadd.f32 %v1454_v60, %v1453_v56 }
 0x197   : > { %v1408_v3 = vpop.f32.mrf.mxu0  ;;  %v1456_v4 = vpop.f32.mrf.mxu1 }
 0x198   : > { %1143 = vst [vmem:[%s2178_s4 + $0x68] sm:$0xff] %v1111_v61  ;;  %1159 = vst [vmem:[%s2178_s4 + $0xe8] sm:$0xff] %v1127_v62  ;;  %v1080_v5 = vmul.f32 %v1407_v63, %v1939_v19  ;;  %v1096_v6 = vmul.f32 %v1455_v0, %v1939_v19 }
 0x199   : > { %v1409_v7 = vpop.f32.mrf.mxu0  ;;  %v1457_v8 = vpop.f32.mrf.mxu1 }
 0x19a   : > { %v1112_v9 = vadd.f32 %v1080_v5, %v1046_v1  ;;  %v1128_v10 = vadd.f32 %v1096_v6, %v1062_v2  ;;  %v1410_v11 = vadd.f32 %v1409_v7, %v1408_v3  ;;  %v1458_v12 = vadd.f32 %v1457_v8, %v1456_v4 }
 0x19c   : > { %1144 = vst [vmem:[%s2178_s4 + $0x70] sm:$0xff] %v1112_v9  ;;  %1160 = vst [vmem:[%s2178_s4 + $0xf0] sm:$0xff] %v1128_v10  ;;  %v1081_v15 = vmul.f32 %v1410_v11, %v1939_v19  ;;  %v1097_v16 = vmul.f32 %v1458_v12, %v1939_v19 }
 0x19e   : > { %v1113_v17 = vadd.f32 %v1081_v15, %v1047_v13  ;;  %v1129_v18 = vadd.f32 %v1097_v16, %v1063_v14 }
 0x1a0   : > { %1145 = vst [vmem:[%s2178_s4 + $0x78] sm:$0xff] %v1113_v17  ;;  %1161 = vst [vmem:[%s2178_s4 + $0xf8] sm:$0xff] %v1129_v18 }
 0x1a1 PF: > { %s15_s17 = sadd.s32 1, %s1615_s17   ;;  %s2181_s15 = smov %s1611_s16 }
 0x1a2   : > { %p12_p3 = scmp.ge.s32.totalorder %s15_s17, 4   ;;  %s2182_s16 = smov %s2184_s19 }
 0x1a4   :  { %14 = sbr.rel (!%p12_p3) target bundleno = 2 (0x2), region = 90 }
 0x1a9   :  { %1184 = vsyncpa [#allocation4], 1 }
 0x1aa   :  { %1186 = vsyncpa [#allocation4 + $0x1], 1 }

// kernel: pshgcn_forward.7
= control target key start
LH: loop header
LB: loop body
LE: loop exit
PB: predicated region body
PF: predicated region fallthrough
CT: control target
= control target key end

     0   :  { %11 = vsyncpa [#allocation4], 0  ;;  %s2037_s18 = smov 0   ;;  %s2039_s19 = smov 0   ;;  %s2616_s0 = inlined_call_operand.vmem [shape: f32[2], index: 0, kind: input, shape index: {}]   ;;  %s2617_s1 = inlined_call_operand.vmem [shape: bf16[2,256,256], index: 1, kind: input, shape index: {}]   ;;  %s2618_s2 = inlined_call_operand.vmem [shape: bf16[1,256,128], index: 2, kind: input, shape index: {}]   ;;  %s2619_s3 = inlined_call_operand.vmem [shape: f32[256,128], index: 3, kind: input, shape index: {}, may-alias: {3,5}]   ;;  %s2620_s4 = inlined_call_operand.vmem [shape: bf16[2,256,128], index: 4, kind: output, shape index: {0}]   ;;  %s2621_s5 = inlined_call_operand.vmem [shape: f32[256,128], index: 5, kind: output, shape index: {1}, may-alias: {3,5}]  }
   0x1   :  { %s2041_s20 = smov 0  }
   0x2 LB: > { %s1509_s21 = sadd.s32 4294967295, %s2004_s20   ;;  %s32_s22 = sadd.s32 1, %s2000_s19  ;;  %s2004_s20 = sphi %s2041_s20, %s17_s20   ;;  %s2000_s19 = sphi %s2039_s19, %s2625_s19   ;;  %s1996_s18 = sphi %s2037_s18, %s2624_s18  }
   0x3   : > { %p34_p0 = scmp.ge.s32.totalorder %s32_s22, 2  ;;  %p1511_p1 = scmp.ge.s32.totalorder %s2004_s20, 1 }
   0x4   : > { %p193_p2 = scmp.lt.s32.totalorder %s2004_s20, 3  ;;  %p2062_p4 = scmp.eq.s32.totalorder %s1509_s21, 0 }
   0x5   : > { %s2627_s22 = smov (%p34_p0, %s32_s22), 0  ;;  %s206_s27 = sshll.u32 %s2616_s0, 4  ;;  %s207_s27 = int_to_ptr.vmem [resolvable:$true] %s206_s27 }
   0x6   : > { %p2058_p3 = pnand %p1511_p1, %p193_p2  ;;  %s1963_s28 = scalar_lea.vmem %s207_s27, 16 }
   0x7   : > { %p1964_p7 = scmp.ne.s32.totalorder %s207_s27, %s1963_s28  ;;  %p1971_p11 = scmp.lt.s32.totalorder %s207_s27, %s207_s27 }
   0x8   : > { %p1868_p5 = pneg %p2058_p3  ;;  %p1972_p12 = scmp.lt.s32.totalorder %s1963_s28, %s1963_s28 }
   0xa   : > { %p1869_p6 = pnand %p2062_p4, %p1868_p5  ;;  %p1973_p13 = por %p1972_p12, %p1971_p11 }
   0xc   : > { %p1965_p8 = pneg %p1869_p6 }
   0xe   : > { %p1966_p9 = pnand %p1965_p8, %p1964_p7 }
  0x10   : > { %p1967_p10 = pneg %p1966_p9 }
  0x12   : > { %p1974_p0 = pnand %p1973_p13, %p1967_p10 }
  0x14   : > { %1977 = shalt.err (!%p1974_p0)
}
  0x15   : > { %s2006_s29 = smov [#allocation3]   ;;  %250 = sbr.rel (%p2058_p3) target bundleno = 418 (0x1a2), region = 36 }
  0x16   : > { %1871 = dma.vmem_to_smem (!%p1869_p6), %s207_s27, 16, %s2006_s29, [#allocation4]  }
  0x1a   : > { %1991 = dma.done.wait (%p2062_p4), [#allocation4], 16  }
  0x1b   : > { %1993 = vsyncadd (%p2062_p4), [#allocation4], 4294967280 }
  0x1c   : > { %256 = sfence }
  0x1d   : > { %p304_p1 = scmp.lt.s32.totalorder %s1996_s18, 1  ;;  %p341_p2 = scmp.eq.s32.totalorder %s1996_s18, 0 }
  0x1e   : > { %v347_v0 = vld [vmem:[%s2619_s3] sm:$0xff] (%p341_p2)  ;;  %v348_v1 = vld [vmem:[%s2619_s3 + $0x8] sm:$0xff] (%p341_p2)  ;;  %v349_v2 = vld [vmem:[%s2619_s3 + $0x10] sm:$0xff] (%p341_p2) }
  0x1f   : > { %s305_s30 = scalar_select %p304_p1, %s1996_s18, 1  ;;  %379 = vst [vmem:[%s2621_s5] sm:$0xff] (%p341_p2), %v347_v0  ;;  %380 = vst [vmem:[%s2621_s5 + $0x8] sm:$0xff] (%p341_p2), %v348_v1 }
  0x20   : > { %346 = sbr.rel (!%p341_p2) target bundleno = 122 (0x7a), region = 44  ;;  %381 = vst [vmem:[%s2621_s5 + $0x10] sm:$0xff] (%p341_p2), %v349_v2 }
  0x21   : > { %s1606_s6 = sshll.u32 %s305_s30, 8  ;;  %s1607_s7 = sshll.u32 %s305_s30, 7 }
  0x22   : > { %s2085_s10 = scalar_lea.vmem %s2617_s1, %s1606_s6  ;;  %s2090_s13 = scalar_lea.vmem %s2620_s4, %s1607_s7 }
  0x27   : > { %v350_v3 = vld [vmem:[%s2619_s3 + $0x18] sm:$0xff]  ;;  %v351_v4 = vld [vmem:[%s2619_s3 + $0x20] sm:$0xff]  ;;  %v352_v5 = vld [vmem:[%s2619_s3 + $0x28] sm:$0xff] }
  0x28   : > { %382 = vst [vmem:[%s2621_s5 + $0x18] sm:$0xff] %v350_v3  ;;  %383 = vst [vmem:[%s2621_s5 + $0x20] sm:$0xff] %v351_v4 }
  0x29   : > { %384 = vst [vmem:[%s2621_s5 + $0x28] sm:$0xff] %v352_v5 }
  0x30   : > { %v353_v6 = vld [vmem:[%s2619_s3 + $0x30] sm:$0xff]  ;;  %v354_v7 = vld [vmem:[%s2619_s3 + $0x38] sm:$0xff]  ;;  %v355_v8 = vld [vmem:[%s2619_s3 + $0x40] sm:$0xff] }
  0x31   : > { %385 = vst [vmem:[%s2621_s5 + $0x30] sm:$0xff] %v353_v6  ;;  %386 = vst [vmem:[%s2621_s5 + $0x38] sm:$0xff] %v354_v7 }
  0x32   : > { %387 = vst [vmem:[%s2621_s5 + $0x40] sm:$0xff] %v355_v8 }
  0x39   : > { %v356_v9 = vld [vmem:[%s2619_s3 + $0x48] sm:$0xff]  ;;  %v357_v10 = vld [vmem:[%s2619_s3 + $0x50] sm:$0xff]  ;;  %v358_v11 = vld [vmem:[%s2619_s3 + $0x58] sm:$0xff] }
  0x3a   : > { %388 = vst [vmem:[%s2621_s5 + $0x48] sm:$0xff] %v356_v9  ;;  %389 = vst [vmem:[%s2621_s5 + $0x50] sm:$0xff] %v357_v10 }
  0x3b   : > { %390 = vst [vmem:[%s2621_s5 + $0x58] sm:$0xff] %v358_v11 }
  0x42   : > { %v359_v12 = vld [vmem:[%s2619_s3 + $0x60] sm:$0xff]  ;;  %v360_v13 = vld [vmem:[%s2619_s3 + $0x68] sm:$0xff]  ;;  %v361_v14 = vld [vmem:[%s2619_s3 + $0x70] sm:$0xff] }
  0x43   : > { %391 = vst [vmem:[%s2621_s5 + $0x60] sm:$0xff] %v359_v12  ;;  %392 = vst [vmem:[%s2621_s5 + $0x68] sm:$0xff] %v360_v13 }
  0x44   : > { %393 = vst [vmem:[%s2621_s5 + $0x70] sm:$0xff] %v361_v14 }
  0x4b   : > { %v362_v15 = vld [vmem:[%s2619_s3 + $0x78] sm:$0xff]  ;;  %v363_v16 = vld [vmem:[%s2619_s3 + $0x80] sm:$0xff]  ;;  %v364_v17 = vld [vmem:[%s2619_s3 + $0x88] sm:$0xff] }
  0x4c   : > { %394 = vst [vmem:[%s2621_s5 + $0x78] sm:$0xff] %v362_v15  ;;  %395 = vst [vmem:[%s2621_s5 + $0x80] sm:$0xff] %v363_v16 }
  0x4d   : > { %396 = vst [vmem:[%s2621_s5 + $0x88] sm:$0xff] %v364_v17 }
  0x54   : > { %v365_v18 = vld [vmem:[%s2619_s3 + $0x90] sm:$0xff]  ;;  %v366_v19 = vld [vmem:[%s2619_s3 + $0x98] sm:$0xff]  ;;  %v367_v20 = vld [vmem:[%s2619_s3 + $0xa0] sm:$0xff] }
  0x55   : > { %397 = vst [vmem:[%s2621_s5 + $0x90] sm:$0xff] %v365_v18  ;;  %398 = vst [vmem:[%s2621_s5 + $0x98] sm:$0xff] %v366_v19 }
  0x56   : > { %399 = vst [vmem:[%s2621_s5 + $0xa0] sm:$0xff] %v367_v20 }
  0x5d   : > { %v368_v21 = vld [vmem:[%s2619_s3 + $0xa8] sm:$0xff]  ;;  %v369_v22 = vld [vmem:[%s2619_s3 + $0xb0] sm:$0xff]  ;;  %v370_v23 = vld [vmem:[%s2619_s3 + $0xb8] sm:$0xff] }
  0x5e   : > { %400 = vst [vmem:[%s2621_s5 + $0xa8] sm:$0xff] %v368_v21  ;;  %401 = vst [vmem:[%s2621_s5 + $0xb0] sm:$0xff] %v369_v22 }
  0x5f   : > { %402 = vst [vmem:[%s2621_s5 + $0xb8] sm:$0xff] %v370_v23 }
  0x66   : > { %v371_v24 = vld [vmem:[%s2619_s3 + $0xc0] sm:$0xff]  ;;  %v372_v25 = vld [vmem:[%s2619_s3 + $0xc8] sm:$0xff]  ;;  %v373_v26 = vld [vmem:[%s2619_s3 + $0xd0] sm:$0xff] }
  0x67   : > { %403 = vst [vmem:[%s2621_s5 + $0xc0] sm:$0xff] %v371_v24  ;;  %404 = vst [vmem:[%s2621_s5 + $0xc8] sm:$0xff] %v372_v25 }
  0x68   : > { %405 = vst [vmem:[%s2621_s5 + $0xd0] sm:$0xff] %v373_v26 }
  0x6f   : > { %v374_v27 = vld [vmem:[%s2619_s3 + $0xd8] sm:$0xff]  ;;  %v375_v28 = vld [vmem:[%s2619_s3 + $0xe0] sm:$0xff]  ;;  %v376_v29 = vld [vmem:[%s2619_s3 + $0xe8] sm:$0xff] }
  0x70   : > { %406 = vst [vmem:[%s2621_s5 + $0xd8] sm:$0xff] %v374_v27  ;;  %407 = vst [vmem:[%s2621_s5 + $0xe0] sm:$0xff] %v375_v28 }
  0x71   : > { %408 = vst [vmem:[%s2621_s5 + $0xe8] sm:$0xff] %v376_v29 }
  0x78   : > { %v377_v30 = vld [vmem:[%s2619_s3 + $0xf0] sm:$0xff]  ;;  %v378_v31 = vld [vmem:[%s2619_s3 + $0xf8] sm:$0xff] }
  0x79   : > { %409 = vst [vmem:[%s2621_s5 + $0xf0] sm:$0xff] %v377_v30  ;;  %410 = vst [vmem:[%s2621_s5 + $0xf8] sm:$0xff] %v378_v31 }
  0x7a PF: > { %v1899_v32 = vld [vmem:[%s2618_s2 + $0x78] sm:$0xff]   ;;  %v1901_v34 = vld [vmem:[%s2618_s2 + $0x70] sm:$0xff]   ;;  %v1903_v36 = vld [vmem:[%s2618_s2 + $0x68] sm:$0xff]   ;;  %s1255_s26 = sld [smem:[#allocation3 + %s1996_s18]] }
  0x7b   : > { %v1900_v33 = vld [vmem:[%s2618_s2 + $0x38] sm:$0xff]   ;;  %1736 = vmatprep.subr.bf16.mxu0 %v1899_v32  ;;  %1848 = vmatprep.subr.bf16.mxu1 %v1899_v32  ;;  %v1902_v35 = vld [vmem:[%s2618_s2 + $0x30] sm:$0xff]   ;;  %v1904_v37 = vld [vmem:[%s2618_s2 + $0x28] sm:$0xff]  }
  0x7c   : > { %1737 = vmatpush3.bf16.msra.mxu0 %v1900_v33  ;;  %1856 = vmatpush3.bf16.msra.mxu1 %v1900_v33  ;;  %v1905_v38 = vld [vmem:[%s2618_s2 + $0x60] sm:$0xff]   ;;  %v1907_v40 = vld [vmem:[%s2618_s2 + $0x58] sm:$0xff]   ;;  %v1909_v42 = vld [vmem:[%s2618_s2 + $0x50] sm:$0xff]  }
  0x7d   : > { %1738 = vmatprep.subr.bf16.mxu0 %v1901_v34  ;;  %1849 = vmatprep.subr.bf16.mxu1 %v1901_v34  ;;  %v1906_v39 = vld [vmem:[%s2618_s2 + $0x20] sm:$0xff]   ;;  %v1908_v41 = vld [vmem:[%s2618_s2 + $0x18] sm:$0xff]   ;;  %v1910_v45 = vld [vmem:[%s2618_s2 + $0x10] sm:$0xff]  }
  0x7e   : > { %v1917_v43 = vld [vmem:[%s2085_s10 + $0x4] ss:$8 sps:$4 sm:$0xff]   ;;  %v1915_v50 = vld [vmem:[%s2085_s10] ss:$8 sps:$4 sm:$0xff]   ;;  %v1921_v52 = vld [vmem:[%s2085_s10 + $0x14] ss:$8 sps:$4 sm:$0xff]  }
  0x7f   : > { %v1920_v44 = vld [vmem:[%s2085_s10 + $0x84] ss:$8 sps:$4 sm:$0xff]   ;;  %835 = vmatprep.mubr.bf16.mxu0 %v1917_v43  ;;  %v1918_v51 = vld [vmem:[%s2085_s10 + $0x80] ss:$8 sps:$4 sm:$0xff]   ;;  %v1923_v53 = vld [vmem:[%s2085_s10 + $0x94] ss:$8 sps:$4 sm:$0xff]  }
  0x80   : > { %1739 = vmatpush3.bf16.msra.mxu0 %v1902_v35  ;;  %1857 = vmatpush3.bf16.msra.mxu1 %v1902_v35  ;;  %v1911_v46 = vld [vmem:[%s2618_s2 + $0x48] sm:$0xff]   ;;  %v1913_v48 = vld [vmem:[%s2618_s2 + $0x40] sm:$0xff]   ;;  %v1925_v54 = vld [vmem:[%s2085_s10 + $0x10] ss:$8 sps:$4 sm:$0xff]   ;;  %v2365_v19 = vstv %s1255_s26 }
  0x81   : > { %1740 = vmatprep.subr.bf16.mxu0 %v1903_v36  ;;  %1850 = vmatprep.subr.bf16.mxu1 %v1903_v36  ;;  %v1912_v47 = vld [vmem:[%s2618_s2 + $0x8] sm:$0xff]   ;;  %v1914_v49 = vld [vmem:[%s2618_s2] sm:$0xff]   ;;  %v1926_v55 = vld [vmem:[%s2085_s10 + $0x90] ss:$8 sps:$4 sm:$0xff]  }
  0x82   : > { %899 = vmatprep.mubr.bf16.mxu1 %v1920_v44  ;;  %v1927_v56 = vld [vmem:[%s2085_s10 + $0x24] ss:$8 sps:$4 sm:$0xff]   ;;  %v1931_v58 = vld [vmem:[%s2085_s10 + $0x20] ss:$8 sps:$4 sm:$0xff]   ;;  %v1933_v60 = vld [vmem:[%s2085_s10 + $0x34] ss:$8 sps:$4 sm:$0xff]  }
  0x83   : > { %v1929_v57 = vld [vmem:[%s2085_s10 + $0xa4] ss:$8 sps:$4 sm:$0xff]   ;;  %v1932_v59 = vld [vmem:[%s2085_s10 + $0xa0] ss:$8 sps:$4 sm:$0xff]   ;;  %v1935_v61 = vld [vmem:[%s2085_s10 + $0xb4] ss:$8 sps:$4 sm:$0xff]  }
  0x84   : > { %1741 = vmatpush3.bf16.msra.mxu0 %v1904_v37  ;;  %1858 = vmatpush3.bf16.msra.mxu1 %v1904_v37  ;;  %v1937_v62 = vld [vmem:[%s2085_s10 + $0x30] ss:$8 sps:$4 sm:$0xff]   ;;  %v1939_v0 = vld [vmem:[%s2085_s10 + $0x44] ss:$8 sps:$4 sm:$0xff]   ;;  %v1943_v2 = vld [vmem:[%s2085_s10 + $0x40] ss:$8 sps:$4 sm:$0xff]  }
  0x85   : > { %1742 = vmatprep.subr.bf16.mxu0 %v1905_v38  ;;  %1851 = vmatprep.subr.bf16.mxu1 %v1905_v38  ;;  %v1938_v63 = vld [vmem:[%s2085_s10 + $0xb0] ss:$8 sps:$4 sm:$0xff]   ;;  %v1941_v1 = vld [vmem:[%s2085_s10 + $0xc4] ss:$8 sps:$4 sm:$0xff]   ;;  %v1944_v3 = vld [vmem:[%s2085_s10 + $0xc0] ss:$8 sps:$4 sm:$0xff]  }
  0x86   : > { %v1945_v4 = vld [vmem:[%s2085_s10 + $0x54] ss:$8 sps:$4 sm:$0xff]   ;;  %v1949_v6 = vld [vmem:[%s2085_s10 + $0x50] ss:$8 sps:$4 sm:$0xff]   ;;  %v1951_v8 = vld [vmem:[%s2085_s10 + $0x64] ss:$8 sps:$4 sm:$0xff]  }
  0x87   : > { %v1947_v5 = vld [vmem:[%s2085_s10 + $0xd4] ss:$8 sps:$4 sm:$0xff]   ;;  %v1950_v7 = vld [vmem:[%s2085_s10 + $0xd0] ss:$8 sps:$4 sm:$0xff]   ;;  %v1953_v9 = vld [vmem:[%s2085_s10 + $0xe4] ss:$8 sps:$4 sm:$0xff]  }
  0x88   : > { %1743 = vmatpush3.bf16.msra.mxu0 %v1906_v39  ;;  %1859 = vmatpush3.bf16.msra.mxu1 %v1906_v39  ;;  %v1955_v10 = vld [vmem:[%s2085_s10 + $0x60] ss:$8 sps:$4 sm:$0xff]   ;;  %v1957_v12 = vld [vmem:[%s2085_s10 + $0x74] ss:$8 sps:$4 sm:$0xff]   ;;  %v1961_v14 = vld [vmem:[%s2085_s10 + $0x70] ss:$8 sps:$4 sm:$0xff]  }
  0x89   : > { %1744 = vmatprep.subr.bf16.mxu0 %v1907_v40  ;;  %1852 = vmatprep.subr.bf16.mxu1 %v1907_v40  ;;  %v1956_v11 = vld [vmem:[%s2085_s10 + $0xe0] ss:$8 sps:$4 sm:$0xff]   ;;  %v1959_v13 = vld [vmem:[%s2085_s10 + $0xf4] ss:$8 sps:$4 sm:$0xff]   ;;  %v1962_v15 = vld [vmem:[%s2085_s10 + $0xf0] ss:$8 sps:$4 sm:$0xff]  }
  0x8a   : > { %v1223_v23 = vld [vmem:[%s2621_s5] sm:$0xff]  ;;  %v1224_v35 = vld [vmem:[%s2621_s5 + $0x8] sm:$0xff] }
  0x8b   : > { %v1239_v24 = vld [vmem:[%s2621_s5 + $0x80] sm:$0xff]  ;;  %v1240_v36 = vld [vmem:[%s2621_s5 + $0x88] sm:$0xff] }
  0x8c   : > { %1745 = vmatpush3.bf16.msra.mxu0 %v1908_v41  ;;  %1860 = vmatpush3.bf16.msra.mxu1 %v1908_v41 }
  0x8d   : > { %1746 = vmatprep.subr.bf16.mxu0 %v1909_v42  ;;  %1853 = vmatprep.subr.bf16.mxu1 %v1909_v42 }
  0x90   : > { %1747 = vmatpush3.bf16.msra.mxu0 %v1910_v45  ;;  %1861 = vmatpush3.bf16.msra.mxu1 %v1910_v45 }
  0x91   : > { %1748 = vmatprep.subr.bf16.mxu0 %v1911_v46  ;;  %1854 = vmatprep.subr.bf16.mxu1 %v1911_v46 }
  0x94   : > { %1749 = vmatpush3.bf16.msra.mxu0 %v1912_v47  ;;  %1862 = vmatpush3.bf16.msra.mxu1 %v1912_v47 }
  0x95   : > { %1750 = vmatprep.subr.bf16.mxu0 %v1913_v48  ;;  %1855 = vmatprep.subr.bf16.mxu1 %v1913_v48 }
  0x98   : > { %1751 = vmatpush3.bf16.msra.mxu0 %v1914_v49  ;;  %1863 = vmatpush3.bf16.msra.mxu1 %v1914_v49  ;;  %v1225_v49 = vld [vmem:[%s2621_s5 + $0x10] sm:$0xff] }
  0x9b   : > { %836 = vmatmul.mubr.bf16.vlgmr.msra.gmra.mxu0 %v1915_v50  ;;  %900 = vmatmul.mubr.bf16.vlgmr.msra.gmra.mxu1 %v1918_v51  ;;  %v1241_v50 = vld [vmem:[%s2621_s5 + $0x90] sm:$0xff] }
  0x9c   : > { %843 = vmatprep.mubr.bf16.mxu0 %v1921_v52  ;;  %907 = vmatprep.mubr.bf16.mxu1 %v1923_v53 }
  0xa3   : > { %844 = vmatmul.mubr.bf16.gmra.mxu0 %v1925_v54  ;;  %908 = vmatmul.mubr.bf16.gmra.mxu1 %v1926_v55 }
  0xa4   : > { %851 = vmatprep.mubr.bf16.mxu0 %v1927_v56  ;;  %915 = vmatprep.mubr.bf16.mxu1 %v1929_v57 }
  0xab   : > { %852 = vmatmul.mubr.bf16.gmra.mxu0 %v1931_v58  ;;  %916 = vmatmul.mubr.bf16.gmra.mxu1 %v1932_v59 }
  0xac   : > { %859 = vmatprep.mubr.bf16.mxu0 %v1933_v60  ;;  %923 = vmatprep.mubr.bf16.mxu1 %v1935_v61  ;;  %v1226_v61 = vld [vmem:[%s2621_s5 + $0x18] sm:$0xff] }
  0xb3   : > { %860 = vmatmul.mubr.bf16.gmra.mxu0 %v1937_v62  ;;  %924 = vmatmul.mubr.bf16.gmra.mxu1 %v1938_v63  ;;  %v1242_v62 = vld [vmem:[%s2621_s5 + $0x98] sm:$0xff] }
  0xb4   : > { %867 = vmatprep.mubr.bf16.mxu0 %v1939_v0  ;;  %931 = vmatprep.mubr.bf16.mxu1 %v1941_v1 }
  0xbb   : > { %868 = vmatmul.mubr.bf16.gmra.mxu0 %v1943_v2  ;;  %932 = vmatmul.mubr.bf16.gmra.mxu1 %v1944_v3 }
  0xbc   : > { %875 = vmatprep.mubr.bf16.mxu0 %v1945_v4  ;;  %939 = vmatprep.mubr.bf16.mxu1 %v1947_v5 }
  0xc3   : > { %876 = vmatmul.mubr.bf16.gmra.mxu0 %v1949_v6  ;;  %940 = vmatmul.mubr.bf16.gmra.mxu1 %v1950_v7 }
  0xc4   : > { %883 = vmatprep.mubr.bf16.mxu0 %v1951_v8  ;;  %947 = vmatprep.mubr.bf16.mxu1 %v1953_v9 }
  0xcb   : > { %884 = vmatmul.mubr.bf16.gmra.mxu0 %v1955_v10  ;;  %948 = vmatmul.mubr.bf16.gmra.mxu1 %v1956_v11  ;;  %v1227_v11 = vld [vmem:[%s2621_s5 + $0x20] sm:$0xff] }
  0xcc   : > { %891 = vmatprep.mubr.bf16.mxu0 %v1957_v12  ;;  %955 = vmatprep.mubr.bf16.mxu1 %v1959_v13  ;;  %v1243_v12 = vld [vmem:[%s2621_s5 + $0xa0] sm:$0xff] }
  0xd3   : > { %892 = vmatmul.mubr.bf16.gmra.mxu0 %v1961_v14  ;;  %956 = vmatmul.mubr.bf16.gmra.mxu1 %v1962_v15 }
 0x15b   : > { %v1752_v16 = vpop.f32.mrf.mxu0  ;;  %v1800_v17 = vpop.f32.mrf.mxu1 }
 0x15d   : > { %v1753_v18 = vpop.f32.mrf.mxu0  ;;  %v1801_v20 = vpop.f32.mrf.mxu1 }
 0x15e   : > { %v1754_v21 = vadd.f32 %v1753_v18, %v1752_v16  ;;  %v1802_v22 = vadd.f32 %v1801_v20, %v1800_v17 }
 0x15f   : > { %v1755_v25 = vpop.f32.mrf.mxu0  ;;  %v1803_v26 = vpop.f32.mrf.mxu1 }
 0x160   : > { %v1257_v27 = vmul.f32 %v1754_v21, %v2365_v19  ;;  %v1273_v28 = vmul.f32 %v1802_v22, %v2365_v19 }
 0x161   : > { %v1756_v29 = vpop.f32.mrf.mxu0  ;;  %v1804_v30 = vpop.f32.mrf.mxu1 }
 0x162   : > { %v1289_v31 = vadd.f32 %v1257_v27, %v1223_v23  ;;  %v1305_v32 = vadd.f32 %v1273_v28, %v1239_v24  ;;  %v1757_v33 = vadd.f32 %v1756_v29, %v1755_v25  ;;  %v1805_v34 = vadd.f32 %v1804_v30, %v1803_v26  ;;  %v1228_v24 = vld [vmem:[%s2621_s5 + $0x28] sm:$0xff] }
 0x163   : > { %v1758_v37 = vpop.f32.mrf.mxu0  ;;  %v1806_v38 = vpop.f32.mrf.mxu1  ;;  %v1244_v25 = vld [vmem:[%s2621_s5 + $0xa8] sm:$0xff] }
 0x164   : > { %1321 = vst [vmem:[%s2621_s5] sm:$0xff] %v1289_v31  ;;  %1337 = vst [vmem:[%s2621_s5 + $0x80] sm:$0xff] %v1305_v32  ;;  %v1644_v39 = vpack.c.bf16 %v1757_v33, %v1754_v21  ;;  %v1258_v40 = vmul.f32 %v1757_v33, %v2365_v19  ;;  %v1684_v41 = vpack.c.bf16 %v1805_v34, %v1802_v22 }
 0x165   : > { %v1274_v42 = vmul.f32 %v1805_v34, %v2365_v19  ;;  %v1759_v43 = vpop.f32.mrf.mxu0  ;;  %v1807_v44 = vpop.f32.mrf.mxu1 }
 0x166   : > { %1645 = vst [vmem:[%s2090_s13] sm:$0xff] %v1644_v39   ;;  %v1290_v45 = vadd.f32 %v1258_v40, %v1224_v35  ;;  %1728 = vst [vmem:[%s2090_s13 + $0x40] sm:$0xff] %v1684_v41   ;;  %v1760_v47 = vadd.f32 %v1759_v43, %v1758_v37  ;;  %v1808_v48 = vadd.f32 %v1807_v44, %v1806_v38  ;;  %v1229_v38 = vld [vmem:[%s2621_s5 + $0x30] sm:$0xff] }
 0x167   : > { %v1306_v46 = vadd.f32 %v1274_v42, %v1240_v36  ;;  %v1761_v51 = vpop.f32.mrf.mxu0  ;;  %v1809_v52 = vpop.f32.mrf.mxu1  ;;  %v1245_v39 = vld [vmem:[%s2621_s5 + $0xb0] sm:$0xff] }
 0x168   : > { %1322 = vst [vmem:[%s2621_s5 + $0x8] sm:$0xff] %v1290_v45  ;;  %v1259_v53 = vmul.f32 %v1760_v47, %v2365_v19  ;;  %v1275_v54 = vmul.f32 %v1808_v48, %v2365_v19 }
 0x169   : > { %1338 = vst [vmem:[%s2621_s5 + $0x88] sm:$0xff] %v1306_v46  ;;  %v1762_v55 = vpop.f32.mrf.mxu0  ;;  %v1810_v56 = vpop.f32.mrf.mxu1 }
 0x16a   : > { %v1291_v57 = vadd.f32 %v1259_v53, %v1225_v49  ;;  %v1307_v58 = vadd.f32 %v1275_v54, %v1241_v50  ;;  %v1763_v59 = vadd.f32 %v1762_v55, %v1761_v51  ;;  %v1811_v60 = vadd.f32 %v1810_v56, %v1809_v52  ;;  %v1230_v50 = vld [vmem:[%s2621_s5 + $0x38] sm:$0xff] }
 0x16b   : > { %v1764_v63 = vpop.f32.mrf.mxu0  ;;  %v1812_v0 = vpop.f32.mrf.mxu1  ;;  %v1246_v51 = vld [vmem:[%s2621_s5 + $0xb8] sm:$0xff] }
 0x16c   : > { %1323 = vst [vmem:[%s2621_s5 + $0x10] sm:$0xff] %v1291_v57  ;;  %1339 = vst [vmem:[%s2621_s5 + $0x90] sm:$0xff] %v1307_v58  ;;  %v1649_v1 = vpack.c.bf16 %v1763_v59, %v1760_v47  ;;  %v1260_v2 = vmul.f32 %v1763_v59, %v2365_v19  ;;  %v1689_v3 = vpack.c.bf16 %v1811_v60, %v1808_v48 }
 0x16d   : > { %v1276_v4 = vmul.f32 %v1811_v60, %v2365_v19  ;;  %v1765_v5 = vpop.f32.mrf.mxu0  ;;  %v1813_v6 = vpop.f32.mrf.mxu1 }
 0x16e   : > { %1721 = vst [vmem:[%s2090_s13 + $0x8] sm:$0xff] %v1649_v1   ;;  %v1292_v7 = vadd.f32 %v1260_v2, %v1226_v61  ;;  %1729 = vst [vmem:[%s2090_s13 + $0x48] sm:$0xff] %v1689_v3   ;;  %v1766_v9 = vadd.f32 %v1765_v5, %v1764_v63  ;;  %v1814_v10 = vadd.f32 %v1813_v6, %v1812_v0  ;;  %v1231_v0 = vld [vmem:[%s2621_s5 + $0x40] sm:$0xff] }
 0x16f   : > { %v1308_v8 = vadd.f32 %v1276_v4, %v1242_v62  ;;  %v1767_v13 = vpop.f32.mrf.mxu0  ;;  %v1815_v14 = vpop.f32.mrf.mxu1  ;;  %v1247_v1 = vld [vmem:[%s2621_s5 + $0xc0] sm:$0xff] }
 0x170   : > { %1324 = vst [vmem:[%s2621_s5 + $0x18] sm:$0xff] %v1292_v7  ;;  %v1261_v15 = vmul.f32 %v1766_v9, %v2365_v19  ;;  %v1277_v16 = vmul.f32 %v1814_v10, %v2365_v19 }
 0x171   : > { %1340 = vst [vmem:[%s2621_s5 + $0x98] sm:$0xff] %v1308_v8  ;;  %v1768_v17 = vpop.f32.mrf.mxu0  ;;  %v1816_v18 = vpop.f32.mrf.mxu1 }
 0x172   : > { %v1293_v20 = vadd.f32 %v1261_v15, %v1227_v11  ;;  %v1309_v21 = vadd.f32 %v1277_v16, %v1243_v12  ;;  %v1769_v22 = vadd.f32 %v1768_v17, %v1767_v13  ;;  %v1817_v23 = vadd.f32 %v1816_v18, %v1815_v14  ;;  %v1232_v12 = vld [vmem:[%s2621_s5 + $0x48] sm:$0xff] }
 0x173   : > { %v1770_v26 = vpop.f32.mrf.mxu0  ;;  %v1818_v27 = vpop.f32.mrf.mxu1  ;;  %v1248_v13 = vld [vmem:[%s2621_s5 + $0xc8] sm:$0xff] }
 0x174   : > { %1325 = vst [vmem:[%s2621_s5 + $0x20] sm:$0xff] %v1293_v20  ;;  %1341 = vst [vmem:[%s2621_s5 + $0xa0] sm:$0xff] %v1309_v21  ;;  %v1654_v28 = vpack.c.bf16 %v1769_v22, %v1766_v9  ;;  %v1262_v29 = vmul.f32 %v1769_v22, %v2365_v19  ;;  %v1694_v30 = vpack.c.bf16 %v1817_v23, %v1814_v10 }
 0x175   : > { %v1278_v31 = vmul.f32 %v1817_v23, %v2365_v19  ;;  %v1771_v32 = vpop.f32.mrf.mxu0  ;;  %v1819_v33 = vpop.f32.mrf.mxu1 }
 0x176   : > { %1722 = vst [vmem:[%s2090_s13 + $0x10] sm:$0xff] %v1654_v28   ;;  %v1294_v34 = vadd.f32 %v1262_v29, %v1228_v24  ;;  %1730 = vst [vmem:[%s2090_s13 + $0x50] sm:$0xff] %v1694_v30   ;;  %v1772_v36 = vadd.f32 %v1771_v32, %v1770_v26  ;;  %v1820_v37 = vadd.f32 %v1819_v33, %v1818_v27  ;;  %v1233_v27 = vld [vmem:[%s2621_s5 + $0x50] sm:$0xff] }
 0x177   : > { %v1310_v35 = vadd.f32 %v1278_v31, %v1244_v25  ;;  %v1773_v40 = vpop.f32.mrf.mxu0  ;;  %v1821_v41 = vpop.f32.mrf.mxu1  ;;  %v1249_v28 = vld [vmem:[%s2621_s5 + $0xd0] sm:$0xff] }
 0x178   : > { %1326 = vst [vmem:[%s2621_s5 + $0x28] sm:$0xff] %v1294_v34  ;;  %v1263_v42 = vmul.f32 %v1772_v36, %v2365_v19  ;;  %v1279_v43 = vmul.f32 %v1820_v37, %v2365_v19 }
 0x179   : > { %1342 = vst [vmem:[%s2621_s5 + $0xa8] sm:$0xff] %v1310_v35  ;;  %v1774_v44 = vpop.f32.mrf.mxu0  ;;  %v1822_v45 = vpop.f32.mrf.mxu1 }
 0x17a   : > { %v1295_v46 = vadd.f32 %v1263_v42, %v1229_v38  ;;  %v1311_v47 = vadd.f32 %v1279_v43, %v1245_v39  ;;  %v1775_v48 = vadd.f32 %v1774_v44, %v1773_v40  ;;  %v1823_v49 = vadd.f32 %v1822_v45, %v1821_v41  ;;  %v1234_v39 = vld [vmem:[%s2621_s5 + $0x58] sm:$0xff] }
 0x17b   : > { %v1776_v52 = vpop.f32.mrf.mxu0  ;;  %v1824_v53 = vpop.f32.mrf.mxu1  ;;  %v1250_v40 = vld [vmem:[%s2621_s5 + $0xd8] sm:$0xff] }
 0x17c   : > { %1327 = vst [vmem:[%s2621_s5 + $0x30] sm:$0xff] %v1295_v46  ;;  %1343 = vst [vmem:[%s2621_s5 + $0xb0] sm:$0xff] %v1311_v47  ;;  %v1659_v54 = vpack.c.bf16 %v1775_v48, %v1772_v36  ;;  %v1264_v55 = vmul.f32 %v1775_v48, %v2365_v19  ;;  %v1699_v56 = vpack.c.bf16 %v1823_v49, %v1820_v37 }
 0x17d   : > { %v1280_v57 = vmul.f32 %v1823_v49, %v2365_v19  ;;  %v1777_v58 = vpop.f32.mrf.mxu0  ;;  %v1825_v59 = vpop.f32.mrf.mxu1 }
 0x17e   : > { %1723 = vst [vmem:[%s2090_s13 + $0x18] sm:$0xff] %v1659_v54   ;;  %v1296_v60 = vadd.f32 %v1264_v55, %v1230_v50  ;;  %1731 = vst [vmem:[%s2090_s13 + $0x58] sm:$0xff] %v1699_v56   ;;  %v1778_v62 = vadd.f32 %v1777_v58, %v1776_v52  ;;  %v1826_v63 = vadd.f32 %v1825_v59, %v1824_v53  ;;  %v1235_v53 = vld [vmem:[%s2621_s5 + $0x60] sm:$0xff] }
 0x17f   : > { %v1312_v61 = vadd.f32 %v1280_v57, %v1246_v51  ;;  %v1779_v2 = vpop.f32.mrf.mxu0  ;;  %v1827_v3 = vpop.f32.mrf.mxu1  ;;  %v1251_v54 = vld [vmem:[%s2621_s5 + $0xe0] sm:$0xff] }
 0x180   : > { %1328 = vst [vmem:[%s2621_s5 + $0x38] sm:$0xff] %v1296_v60  ;;  %v1265_v4 = vmul.f32 %v1778_v62, %v2365_v19  ;;  %v1281_v5 = vmul.f32 %v1826_v63, %v2365_v19 }
 0x181   : > { %1344 = vst [vmem:[%s2621_s5 + $0xb8] sm:$0xff] %v1312_v61  ;;  %v1780_v6 = vpop.f32.mrf.mxu0  ;;  %v1828_v7 = vpop.f32.mrf.mxu1 }
 0x182   : > { %v1297_v8 = vadd.f32 %v1265_v4, %v1231_v0  ;;  %v1313_v9 = vadd.f32 %v1281_v5, %v1247_v1  ;;  %v1781_v10 = vadd.f32 %v1780_v6, %v1779_v2  ;;  %v1829_v11 = vadd.f32 %v1828_v7, %v1827_v3  ;;  %v1236_v1 = vld [vmem:[%s2621_s5 + $0x68] sm:$0xff] }
 0x183   : > { %v1782_v14 = vpop.f32.mrf.mxu0  ;;  %v1830_v15 = vpop.f32.mrf.mxu1  ;;  %v1252_v2 = vld [vmem:[%s2621_s5 + $0xe8] sm:$0xff] }
 0x184   : > { %1329 = vst [vmem:[%s2621_s5 + $0x40] sm:$0xff] %v1297_v8  ;;  %1345 = vst [vmem:[%s2621_s5 + $0xc0] sm:$0xff] %v1313_v9  ;;  %v1664_v16 = vpack.c.bf16 %v1781_v10, %v1778_v62  ;;  %v1266_v17 = vmul.f32 %v1781_v10, %v2365_v19  ;;  %v1704_v18 = vpack.c.bf16 %v1829_v11, %v1826_v63 }
 0x185   : > { %v1282_v20 = vmul.f32 %v1829_v11, %v2365_v19  ;;  %v1783_v21 = vpop.f32.mrf.mxu0  ;;  %v1831_v22 = vpop.f32.mrf.mxu1 }
 0x186   : > { %1724 = vst [vmem:[%s2090_s13 + $0x20] sm:$0xff] %v1664_v16   ;;  %v1298_v23 = vadd.f32 %v1266_v17, %v1232_v12  ;;  %1732 = vst [vmem:[%s2090_s13 + $0x60] sm:$0xff] %v1704_v18   ;;  %v1784_v25 = vadd.f32 %v1783_v21, %v1782_v14  ;;  %v1832_v26 = vadd.f32 %v1831_v22, %v1830_v15  ;;  %v1237_v15 = vld [vmem:[%s2621_s5 + $0x70] sm:$0xff] }
 0x187   : > { %v1314_v24 = vadd.f32 %v1282_v20, %v1248_v13  ;;  %v1785_v29 = vpop.f32.mrf.mxu0  ;;  %v1833_v30 = vpop.f32.mrf.mxu1  ;;  %v1253_v16 = vld [vmem:[%s2621_s5 + $0xf0] sm:$0xff] }
 0x188   : > { %1330 = vst [vmem:[%s2621_s5 + $0x48] sm:$0xff] %v1298_v23  ;;  %v1267_v31 = vmul.f32 %v1784_v25, %v2365_v19  ;;  %v1283_v32 = vmul.f32 %v1832_v26, %v2365_v19 }
 0x189   : > { %1346 = vst [vmem:[%s2621_s5 + $0xc8] sm:$0xff] %v1314_v24  ;;  %v1786_v33 = vpop.f32.mrf.mxu0  ;;  %v1834_v34 = vpop.f32.mrf.mxu1 }
 0x18a   : > { %v1299_v35 = vadd.f32 %v1267_v31, %v1233_v27  ;;  %v1315_v36 = vadd.f32 %v1283_v32, %v1249_v28  ;;  %v1787_v37 = vadd.f32 %v1786_v33, %v1785_v29  ;;  %v1835_v38 = vadd.f32 %v1834_v34, %v1833_v30  ;;  %v1238_v28 = vld [vmem:[%s2621_s5 + $0x78] sm:$0xff] }
 0x18b   : > { %v1788_v41 = vpop.f32.mrf.mxu0  ;;  %v1836_v42 = vpop.f32.mrf.mxu1  ;;  %v1254_v29 = vld [vmem:[%s2621_s5 + $0xf8] sm:$0xff] }
 0x18c   : > { %1331 = vst [vmem:[%s2621_s5 + $0x50] sm:$0xff] %v1299_v35  ;;  %1347 = vst [vmem:[%s2621_s5 + $0xd0] sm:$0xff] %v1315_v36  ;;  %v1669_v43 = vpack.c.bf16 %v1787_v37, %v1784_v25  ;;  %v1268_v44 = vmul.f32 %v1787_v37, %v2365_v19  ;;  %v1709_v45 = vpack.c.bf16 %v1835_v38, %v1832_v26 }
 0x18d   : > { %v1284_v46 = vmul.f32 %v1835_v38, %v2365_v19  ;;  %v1789_v47 = vpop.f32.mrf.mxu0  ;;  %v1837_v48 = vpop.f32.mrf.mxu1 }
 0x18e   : > { %1725 = vst [vmem:[%s2090_s13 + $0x28] sm:$0xff] %v1669_v43   ;;  %v1300_v49 = vadd.f32 %v1268_v44, %v1234_v39  ;;  %1733 = vst [vmem:[%s2090_s13 + $0x68] sm:$0xff] %v1709_v45   ;;  %v1790_v51 = vadd.f32 %v1789_v47, %v1788_v41  ;;  %v1838_v52 = vadd.f32 %v1837_v48, %v1836_v42 }
 0x18f   : > { %v1316_v50 = vadd.f32 %v1284_v46, %v1250_v40  ;;  %v1791_v55 = vpop.f32.mrf.mxu0  ;;  %v1839_v56 = vpop.f32.mrf.mxu1 }
 0x190   : > { %1332 = vst [vmem:[%s2621_s5 + $0x58] sm:$0xff] %v1300_v49  ;;  %v1269_v57 = vmul.f32 %v1790_v51, %v2365_v19  ;;  %v1285_v58 = vmul.f32 %v1838_v52, %v2365_v19 }
 0x191   : > { %1348 = vst [vmem:[%s2621_s5 + $0xd8] sm:$0xff] %v1316_v50  ;;  %v1792_v59 = vpop.f32.mrf.mxu0  ;;  %v1840_v60 = vpop.f32.mrf.mxu1 }
 0x192   : > { %v1301_v61 = vadd.f32 %v1269_v57, %v1235_v53  ;;  %v1317_v62 = vadd.f32 %v1285_v58, %v1251_v54  ;;  %v1793_v63 = vadd.f32 %v1792_v59, %v1791_v55  ;;  %v1841_v0 = vadd.f32 %v1840_v60, %v1839_v56 }
 0x193   : > { %v1794_v3 = vpop.f32.mrf.mxu0  ;;  %v1842_v4 = vpop.f32.mrf.mxu1 }
 0x194   : > { %1333 = vst [vmem:[%s2621_s5 + $0x60] sm:$0xff] %v1301_v61  ;;  %1349 = vst [vmem:[%s2621_s5 + $0xe0] sm:$0xff] %v1317_v62  ;;  %v1674_v5 = vpack.c.bf16 %v1793_v63, %v1790_v51  ;;  %v1270_v6 = vmul.f32 %v1793_v63, %v2365_v19  ;;  %v1714_v7 = vpack.c.bf16 %v1841_v0, %v1838_v52 }
 0x195   : > { %v1286_v8 = vmul.f32 %v1841_v0, %v2365_v19  ;;  %v1795_v9 = vpop.f32.mrf.mxu0  ;;  %v1843_v10 = vpop.f32.mrf.mxu1 }
 0x196   : > { %1726 = vst [vmem:[%s2090_s13 + $0x30] sm:$0xff] %v1674_v5   ;;  %v1302_v11 = vadd.f32 %v1270_v6, %v1236_v1  ;;  %1734 = vst [vmem:[%s2090_s13 + $0x70] sm:$0xff] %v1714_v7   ;;  %v1796_v13 = vadd.f32 %v1795_v9, %v1794_v3  ;;  %v1844_v14 = vadd.f32 %v1843_v10, %v1842_v4 }
 0x197   : > { %v1318_v12 = vadd.f32 %v1286_v8, %v1252_v2  ;;  %v1797_v17 = vpop.f32.mrf.mxu0  ;;  %v1845_v18 = vpop.f32.mrf.mxu1 }
 0x198   : > { %1334 = vst [vmem:[%s2621_s5 + $0x68] sm:$0xff] %v1302_v11  ;;  %v1271_v20 = vmul.f32 %v1796_v13, %v2365_v19  ;;  %v1287_v21 = vmul.f32 %v1844_v14, %v2365_v19 }
 0x199   : > { %1350 = vst [vmem:[%s2621_s5 + $0xe8] sm:$0xff] %v1318_v12  ;;  %v1798_v22 = vpop.f32.mrf.mxu0  ;;  %v1846_v23 = vpop.f32.mrf.mxu1 }
 0x19a   : > { %v1303_v24 = vadd.f32 %v1271_v20, %v1237_v15  ;;  %v1319_v25 = vadd.f32 %v1287_v21, %v1253_v16  ;;  %v1799_v26 = vadd.f32 %v1798_v22, %v1797_v17  ;;  %v1847_v27 = vadd.f32 %v1846_v23, %v1845_v18 }
 0x19c   : > { %1335 = vst [vmem:[%s2621_s5 + $0x70] sm:$0xff] %v1303_v24  ;;  %1351 = vst [vmem:[%s2621_s5 + $0xf0] sm:$0xff] %v1319_v25  ;;  %v1679_v30 = vpack.c.bf16 %v1799_v26, %v1796_v13  ;;  %v1272_v31 = vmul.f32 %v1799_v26, %v2365_v19  ;;  %v1719_v32 = vpack.c.bf16 %v1847_v27, %v1844_v14 }
 0x19d   : > { %v1288_v33 = vmul.f32 %v1847_v27, %v2365_v19 }
 0x19e   : > { %1727 = vst [vmem:[%s2090_s13 + $0x38] sm:$0xff] %v1679_v30   ;;  %v1304_v34 = vadd.f32 %v1272_v31, %v1238_v28  ;;  %1735 = vst [vmem:[%s2090_s13 + $0x78] sm:$0xff] %v1719_v32  }
 0x19f   : > { %v1320_v35 = vadd.f32 %v1288_v33, %v1254_v29 }
 0x1a0   : > { %1336 = vst [vmem:[%s2621_s5 + $0x78] sm:$0xff] %v1304_v34 }
 0x1a1   : > { %1352 = vst [vmem:[%s2621_s5 + $0xf8] sm:$0xff] %v1320_v35 }
 0x1a2 PF: > { %s17_s20 = sadd.s32 1, %s2004_s20   ;;  %s2624_s18 = smov %s2000_s19 }
 0x1a3   : > { %p14_p3 = scmp.ge.s32.totalorder %s17_s20, 4   ;;  %s2625_s19 = smov %s2627_s22 }
 0x1a5   :  { %16 = sbr.rel (!%p14_p3) target bundleno = 2 (0x2), region = 99 }
 0x1aa   :  { %1400 = vsyncpa [#allocation4], 1 }
 0x1ab   :  { %1402 = vsyncpa [#allocation4 + $0x1], 1 }

// kernel: pshgcn_forward.11
= control target key start
LH: loop header
LB: loop body
LE: loop exit
PB: predicated region body
PF: predicated region fallthrough
CT: control target
= control target key end

     0   :  { %vm198_vm0 = vcmask 64512   ;;  %s523_s1 = inlined_call_operand.vmem [shape: f32[128,8], index: 1, kind: input, shape index: {}]   ;;  %s524_s0 = inlined_call_operand.vmem [shape: f32[128,128], index: 0, kind: input, shape index: {}]   ;;  %s525_s2 = inlined_call_operand.vmem [shape: f32[1,8], index: 2, kind: input, shape index: {}]   ;;  %s526_s3 = inlined_call_operand.vmem [shape: f32[128,8], index: 3, kind: output, shape index: {}]  }
   0x1   :  { %v45_v0 = vld [vmem:[%s523_s1 + $0x78] sm:$0xff]  ;;  %v44_v1 = vld [vmem:[%s523_s1 + $0x70] sm:$0xff]  ;;  %v43_v2 = vld [vmem:[%s523_s1 + $0x68] sm:$0xff] }
   0x2   :  { %252 = vmatprep.subr.mxu0 %v45_v0  ;;  %308 = vmatprep.subr.mxu1 %v45_v0  ;;  %v42_v3 = vld [vmem:[%s523_s1 + $0x60] sm:$0xff]  ;;  %v41_v4 = vld [vmem:[%s523_s1 + $0x58] sm:$0xff]  ;;  %v40_v5 = vld [vmem:[%s523_s1 + $0x50] sm:$0xff] }
   0x3   :  { %253 = vmatpush3.msra.mxu0 %v45_v0  ;;  %324 = vmatpush3.msra.mxu1 %v45_v0  ;;  %v39_v6 = vld [vmem:[%s523_s1 + $0x48] sm:$0xff]  ;;  %v38_v7 = vld [vmem:[%s523_s1 + $0x40] sm:$0xff]  ;;  %v37_v8 = vld [vmem:[%s523_s1 + $0x38] sm:$0xff] }
   0x4   :  { %254 = vmatprep.subr.mxu0 %v44_v1  ;;  %309 = vmatprep.subr.mxu1 %v44_v1  ;;  %v36_v9 = vld [vmem:[%s523_s1 + $0x30] sm:$0xff]  ;;  %v35_v10 = vld [vmem:[%s523_s1 + $0x28] sm:$0xff]  ;;  %v34_v11 = vld [vmem:[%s523_s1 + $0x20] sm:$0xff] }
   0x5   :  { %255 = vmatpush3.msra.mxu0 %v44_v1  ;;  %325 = vmatpush3.msra.mxu1 %v44_v1  ;;  %v33_v12 = vld [vmem:[%s523_s1 + $0x18] sm:$0xff]  ;;  %v32_v13 = vld [vmem:[%s523_s1 + $0x10] sm:$0xff]  ;;  %v31_v14 = vld [vmem:[%s523_s1 + $0x8] sm:$0xff] }
   0x6   :  { %256 = vmatprep.subr.mxu0 %v43_v2  ;;  %310 = vmatprep.subr.mxu1 %v43_v2  ;;  %v30_v15 = vld [vmem:[%s523_s1] sm:$0xff]  ;;  %v15_v18 = vld [vmem:[%s524_s0 + $0x8] sm:$0xff]  ;;  %v16_v20 = vld [vmem:[%s524_s0 + $0x10] sm:$0xff] }
   0x7   :  { %257 = vmatpush3.msra.mxu0 %v43_v2  ;;  %326 = vmatpush3.msra.mxu1 %v43_v2  ;;  %v14_v16 = vld [vmem:[%s524_s0] sm:$0xff]  ;;  %v23_v19 = vld [vmem:[%s524_s0 + $0x48] sm:$0xff]  ;;  %v24_v21 = vld [vmem:[%s524_s0 + $0x50] sm:$0xff] }
   0x8   :  { %258 = vmatprep.subr.mxu0 %v42_v3  ;;  %311 = vmatprep.subr.mxu1 %v42_v3  ;;  %v22_v17 = vld [vmem:[%s524_s0 + $0x40] sm:$0xff]  ;;  %v17_v22 = vld [vmem:[%s524_s0 + $0x18] sm:$0xff]  ;;  %v19_v26 = vld [vmem:[%s524_s0 + $0x28] sm:$0xff] }
   0x9   :  { %259 = vmatpush3.msra.mxu0 %v42_v3  ;;  %327 = vmatpush3.msra.mxu1 %v42_v3  ;;  %v25_v23 = vld [vmem:[%s524_s0 + $0x58] sm:$0xff]  ;;  %v18_v24 = vld [vmem:[%s524_s0 + $0x20] sm:$0xff]  ;;  %v27_v27 = vld [vmem:[%s524_s0 + $0x68] sm:$0xff] }
   0xa   :  { %260 = vmatprep.subr.mxu0 %v41_v4  ;;  %312 = vmatprep.subr.mxu1 %v41_v4  ;;  %v26_v25 = vld [vmem:[%s524_s0 + $0x60] sm:$0xff]  ;;  %v20_v28 = vld [vmem:[%s524_s0 + $0x30] sm:$0xff]  ;;  %v21_v30 = vld [vmem:[%s524_s0 + $0x38] sm:$0xff] }
   0xb   :  { %261 = vmatpush3.msra.mxu0 %v41_v4  ;;  %328 = vmatpush3.msra.mxu1 %v41_v4  ;;  %v28_v29 = vld [vmem:[%s524_s0 + $0x70] sm:$0xff]  ;;  %v29_v31 = vld [vmem:[%s524_s0 + $0x78] sm:$0xff]  ;;  %v219_v32 = vld [vmem:[%s525_s2] ss:$0 sm:$0xff] }
   0xc   :  { %262 = vmatprep.subr.mxu0 %v40_v5  ;;  %313 = vmatprep.subr.mxu1 %v40_v5 }
   0xd   :  { %263 = vmatpush3.msra.mxu0 %v40_v5  ;;  %329 = vmatpush3.msra.mxu1 %v40_v5 }
   0xe   :  { %264 = vmatprep.subr.mxu0 %v39_v6  ;;  %314 = vmatprep.subr.mxu1 %v39_v6 }
   0xf   :  { %265 = vmatpush3.msra.mxu0 %v39_v6  ;;  %330 = vmatpush3.msra.mxu1 %v39_v6 }
  0x10   :  { %266 = vmatprep.subr.mxu0 %v38_v7  ;;  %315 = vmatprep.subr.mxu1 %v38_v7 }
  0x11   :  { %267 = vmatpush3.msra.mxu0 %v38_v7  ;;  %331 = vmatpush3.msra.mxu1 %v38_v7 }
  0x12   :  { %268 = vmatprep.subr.mxu0 %v37_v8  ;;  %316 = vmatprep.subr.mxu1 %v37_v8 }
  0x13   :  { %269 = vmatpush3.msra.mxu0 %v37_v8  ;;  %332 = vmatpush3.msra.mxu1 %v37_v8 }
  0x14   :  { %270 = vmatprep.subr.mxu0 %v36_v9  ;;  %317 = vmatprep.subr.mxu1 %v36_v9 }
  0x15   :  { %271 = vmatpush3.msra.mxu0 %v36_v9  ;;  %333 = vmatpush3.msra.mxu1 %v36_v9 }
  0x16   :  { %272 = vmatprep.subr.mxu0 %v35_v10  ;;  %318 = vmatprep.subr.mxu1 %v35_v10 }
  0x17   :  { %273 = vmatpush3.msra.mxu0 %v35_v10  ;;  %334 = vmatpush3.msra.mxu1 %v35_v10 }
  0x18   :  { %274 = vmatprep.subr.mxu0 %v34_v11  ;;  %319 = vmatprep.subr.mxu1 %v34_v11 }
  0x19   :  { %275 = vmatpush3.msra.mxu0 %v34_v11  ;;  %335 = vmatpush3.msra.mxu1 %v34_v11 }
  0x1a   :  { %276 = vmatprep.subr.mxu0 %v33_v12  ;;  %320 = vmatprep.subr.mxu1 %v33_v12 }
  0x1b   :  { %277 = vmatpush3.msra.mxu0 %v33_v12  ;;  %336 = vmatpush3.msra.mxu1 %v33_v12 }
  0x1c   :  { %278 = vmatprep.subr.mxu0 %v32_v13  ;;  %321 = vmatprep.subr.mxu1 %v32_v13 }
  0x1d   :  { %279 = vmatpush3.msra.mxu0 %v32_v13  ;;  %337 = vmatpush3.msra.mxu1 %v32_v13 }
  0x1e   :  { %280 = vmatprep.subr.mxu0 %v31_v14  ;;  %322 = vmatprep.subr.mxu1 %v31_v14 }
  0x1f   :  { %281 = vmatpush3.msra.mxu0 %v31_v14  ;;  %338 = vmatpush3.msra.mxu1 %v31_v14 }
  0x20   :  { %282 = vmatprep.subr.mxu0 %v30_v15  ;;  %323 = vmatprep.subr.mxu1 %v30_v15 }
  0x21   :  { %283 = vmatpush3.msra.mxu0 %v30_v15  ;;  %339 = vmatpush3.msra.mxu1 %v30_v15 }
  0x22   :  { %284 = vmatprep.mubr.f32.mxu0 %v14_v16  ;;  %296 = vmatprep.mubr.f32.mxu1 %v22_v17 }
  0x23   :  { %285 = vmatmul.mubr.f32.vlgmr.msra.gmra.mxu0 %v15_v18  ;;  %297 = vmatmul.mubr.f32.vlgmr.msra.gmra.mxu1 %v23_v19 }
  0x24   :  { %287 = vmatprep.mubr.f32.mxu0 %v16_v20  ;;  %299 = vmatprep.mubr.f32.mxu1 %v24_v21 }
  0x27   :  { %288 = vmatmul.mubr.f32.gmra.mxu0 %v17_v22  ;;  %300 = vmatmul.mubr.f32.gmra.mxu1 %v25_v23 }
  0x28   :  { %290 = vmatprep.mubr.f32.mxu0 %v18_v24  ;;  %302 = vmatprep.mubr.f32.mxu1 %v26_v25 }
  0x2b   :  { %291 = vmatmul.mubr.f32.gmra.mxu0 %v19_v26  ;;  %303 = vmatmul.mubr.f32.gmra.mxu1 %v27_v27 }
  0x2c   :  { %293 = vmatprep.mubr.f32.mxu0 %v20_v28  ;;  %305 = vmatprep.mubr.f32.mxu1 %v28_v29 }
  0x2f   :  { %294 = vmatmul.mubr.f32.gmra.mxu0 %v21_v30  ;;  %306 = vmatmul.mubr.f32.gmra.mxu1 %v29_v31 }
  0xe3   :  { %v286_v33 = vpop.f32.mrf.mxu0  ;;  %v298_v34 = vpop.f32.mrf.mxu1 }
  0xe4   :  { %v125_v35 = vadd.f32 %v286_v33, %v219_v32  ;;  %v165_v36 = vadd.f32 %v298_v34, %v219_v32 }
  0xe5   :  { %v119_v37 = vpop.f32.mrf.mxu0  ;;  %v159_v38 = vpop.f32.mrf.mxu1 }
  0xe6   :  { %200 = vst.msk [vmem:[%s526_s3 + $0x8] sm:$0xff] %vm198_vm0, %v125_v35  ;;  %208 = vst.msk [vmem:[%s526_s3 + $0x48] sm:$0xff] %vm198_vm0, %v165_v36  ;;  %v120_v39 = vadd.f32 %v219_v32, %v119_v37  ;;  %v160_v40 = vadd.f32 %v219_v32, %v159_v38 }
  0xe7   :  { %v289_v41 = vpop.f32.mrf.mxu0  ;;  %v301_v42 = vpop.f32.mrf.mxu1 }
  0xe8   :  { %199 = vst.msk [vmem:[%s526_s3] sm:$0xff] %vm198_vm0, %v120_v39  ;;  %207 = vst.msk [vmem:[%s526_s3 + $0x40] sm:$0xff] %vm198_vm0, %v160_v40  ;;  %v135_v43 = vadd.f32 %v289_v41, %v219_v32  ;;  %v175_v44 = vadd.f32 %v301_v42, %v219_v32 }
  0xe9   :  { %v129_v45 = vpop.f32.mrf.mxu0  ;;  %v169_v46 = vpop.f32.mrf.mxu1 }
  0xea   :  { %202 = vst.msk [vmem:[%s526_s3 + $0x18] sm:$0xff] %vm198_vm0, %v135_v43  ;;  %210 = vst.msk [vmem:[%s526_s3 + $0x58] sm:$0xff] %vm198_vm0, %v175_v44  ;;  %v130_v47 = vadd.f32 %v219_v32, %v129_v45  ;;  %v170_v48 = vadd.f32 %v219_v32, %v169_v46 }
  0xeb   :  { %v292_v49 = vpop.f32.mrf.mxu0  ;;  %v304_v50 = vpop.f32.mrf.mxu1 }
  0xec   :  { %201 = vst.msk [vmem:[%s526_s3 + $0x10] sm:$0xff] %vm198_vm0, %v130_v47  ;;  %209 = vst.msk [vmem:[%s526_s3 + $0x50] sm:$0xff] %vm198_vm0, %v170_v48  ;;  %v145_v51 = vadd.f32 %v292_v49, %v219_v32  ;;  %v185_v52 = vadd.f32 %v304_v50, %v219_v32 }
  0xed   :  { %v139_v53 = vpop.f32.mrf.mxu0  ;;  %v179_v54 = vpop.f32.mrf.mxu1 }
  0xee   :  { %204 = vst.msk [vmem:[%s526_s3 + $0x28] sm:$0xff] %vm198_vm0, %v145_v51  ;;  %212 = vst.msk [vmem:[%s526_s3 + $0x68] sm:$0xff] %vm198_vm0, %v185_v52  ;;  %v140_v55 = vadd.f32 %v219_v32, %v139_v53  ;;  %v180_v56 = vadd.f32 %v219_v32, %v179_v54 }
  0xef   :  { %v295_v57 = vpop.f32.mrf.mxu0  ;;  %v307_v58 = vpop.f32.mrf.mxu1 }
  0xf0   :  { %203 = vst.msk [vmem:[%s526_s3 + $0x20] sm:$0xff] %vm198_vm0, %v140_v55  ;;  %211 = vst.msk [vmem:[%s526_s3 + $0x60] sm:$0xff] %vm198_vm0, %v180_v56  ;;  %v155_v59 = vadd.f32 %v295_v57, %v219_v32  ;;  %v195_v60 = vadd.f32 %v307_v58, %v219_v32 }
  0xf1   :  { %v149_v61 = vpop.f32.mrf.mxu0  ;;  %v189_v62 = vpop.f32.mrf.mxu1 }
  0xf2   :  { %206 = vst.msk [vmem:[%s526_s3 + $0x38] sm:$0xff] %vm198_vm0, %v155_v59  ;;  %214 = vst.msk [vmem:[%s526_s3 + $0x78] sm:$0xff] %vm198_vm0, %v195_v60  ;;  %v150_v63 = vadd.f32 %v219_v32, %v149_v61  ;;  %v190_v0 = vadd.f32 %v219_v32, %v189_v62 }
  0xf4   :  { %205 = vst.msk [vmem:[%s526_s3 + $0x30] sm:$0xff] %vm198_vm0, %v150_v63  ;;  %213 = vst.msk [vmem:[%s526_s3 + $0x70] sm:$0xff] %vm198_vm0, %v190_v0 }

</bundles_post_ra>
